<compile_context>
chip_gen: v6e
topology: v6e:2x2x1
jax: 0.10.0
libtpu: 0.0.40
codegen_flags: <defaults>
</compile_context>

<pallas_src>
import math
import jax
import jax.numpy as jnp
from jax.experimental import pallas as pl
from jax.experimental.pallas import tpu as pltpu


# ----------------------------------------------------------------------------- helpers
def _round_up(n, m):
    return -(-n // m) * m


def _pack_layout(dims):
    """Row offsets / total rows / lane width of the packed bf16 weight slab."""
    F, E, H, O, L = dims
    wlane = _round_up(max(4 * H, L * 4 * H, 128), 128)
    offs, r = {}, 0
    for name, rows in (("w_front", F), ("w_rec", L * H), ("w_out", H)):
        offs[name] = r                       # every block starts 16-row aligned (bf16 tile)
        r += _round_up(rows, 16)
    return offs, r, wlane


# ----------------------------------------------------------------------------- kernel
def _build_kernel(dims, B, T):
    F, E, H, O, L = dims
    G = 4 * H
    offs, _, _ = _pack_layout(dims)
    out_lanes = _round_up(O, 128)
    bf16, f32 = jnp.bfloat16, jnp.float32

    def kernel(xlen_ref, x_ref, w_ref, b_ref, out_ref, hcat_ref):
        # ---------------- hoisted parameter loads (once, above the unrolled loop) -----
        w_front = w_ref[offs["w_front"]:offs["w_front"] + F, :G]          # (F, 4H)    bf16
        w_rec = w_ref[offs["w_rec"]:offs["w_rec"] + L * H, :L * G]        # (LH, L*4H) bf16
        w_out = w_ref[offs["w_out"]:offs["w_out"] + H, :out_lanes]        # (H, 128)   bf16
        b_front = b_ref[0:1, :G]                                          # (1, 4H)    f32
        b_rec = b_ref[1:2, :L * G]                                        # (1, L*4H)  f32
        b_out = b_ref[2:3, :out_lanes]                                    # (1, 128)   f32
        xlen = xlen_ref[...]                                              # (B, 1)     int32

        # ---------------- time-invariant front path: ONE fused matmul ------------------
        # BN(eval) + Linear(F,E) + Linear(E,E) + layer-0 x@W_ih + all their biases were
        # folded into (W_front, b_front) at packing time (no nonlinearity between them).
        pre0 = jnp.dot(x_ref[...].astype(bf16), w_front,
                       preferred_element_type=f32) + b_front              # (T*B, 4H) f32

        def cell(gates, c_prev):
            # 2 full-vreg EUP passes on the (B, 4H)=one-vreg gate slab (gate order i,f,g,o);
            # only static H-wide lane selects remain.  (For much larger H, apply tanh only
            # to the g slice and sigmoid only to i/f/o at vreg granularity.)
            sg = jax.nn.sigmoid(gates)
            tg = jnp.tanh(gates)
            c_new = sg[:, H:2 * H] * c_prev + sg[:, :H] * tg[:, 2 * H:3 * H]
            h_new = sg[:, 3 * H:] * jnp.tanh(c_new)
            return h_new, c_new

        # ---------------- wavefront recurrence -----------------------------------------
        # Layer l at wavefront step s handles time t = s - l, so every step needs exactly
        # ONE matmul with a single constant RHS:
        #   gates_all = [h_0 | h_1 | ... | h_{L-1}] @ W_rec + b_rec
        # where W_rec has W_hh_l on the diagonal blocks and W_ih_{l+1} on the super-diagonal.
        hcat_ref[...] = jnp.zeros((B, L * H), f32)     # lane-sliced hidden-state buffer
        c = [jnp.zeros((B, H), f32) for _ in range(L)]
        last_h = jnp.zeros((B, H), f32)

        # T, L small & static -> fully unrolled; wavefront edges resolved at trace time.
        # (For large T switch to lax.fori_loop with h/c carries; for large B add a
        #  "parallel" batch grid axis so both v7x TensorCores are used.)
        for s in range(T + L - 1):
            gates_all = jnp.dot(hcat_ref[...].astype(bf16), w_rec,
                                preferred_element_type=f32) + b_rec       # (B, L*4H)
            for l in range(L):
                t = s - l
                if t < 0 or t >= T:          # this layer is outside the wavefront this step
                    continue
                g = gates_all[:, l * G:(l + 1) * G]
                if l == 0:
                    g = g + pre0[t * B:(t + 1) * B, :]   # precomputed input-to-gates slab
                h_new, c[l] = cell(g, c[l])
                # fixed lane-slice write into the matmul LHS buffer (no per-step concat)
                hcat_ref[:, l * H:(l + 1) * H] = h_new
                if l == L - 1:
                    # packed-sequence "last valid output": top-layer h at t == x_len - 1
                    last_h = jnp.where(xlen == (t + 1), h_new, last_h)

        # ---------------- fused output head + lane-dense (128-wide) writeback ----------
        out_ref[...] = jnp.dot(last_h.astype(bf16), w_out,
                               preferred_element_type=f32) + b_out

    return kernel


# ----------------------------------------------------------------------------- wrapper
def lstm_forward(params, x, x_len):
    B, T, F = x.shape
    F_, E, H, O, L = params["dims"]
    assert F == F_
    out_lanes = _round_up(O, 128)
    # layout plumbing only: time-major flatten so pre0[t*B:(t+1)*B] is the step-t slab
    x_tm = jnp.transpose(x, (1, 0, 2)).reshape(T * B, F).astype(jnp.float32)
    # PyTorch pack_padded_sequence rejects lengths 0 / > T; clamp so the select always fires
    xlen = jnp.clip(x_len.astype(jnp.int32), 1, T).reshape(B, 1)

    kernel = _build_kernel(params["dims"], B, T)
    vmem = pl.BlockSpec(memory_space=pltpu.MemorySpace.VMEM)
    y_pad = pl.pallas_call(
        kernel,
        out_shape=jax.ShapeDtypeStruct((B, out_lanes), jnp.float32),
        in_specs=[vmem, vmem, vmem, vmem],
        out_specs=vmem,
        scratch_shapes=[pltpu.VMEM((B, L * H), jnp.float32)],   # wavefront LHS buffer
    )(xlen, x_tm, params["w_pack"], params["b_pack"])
    return y_pad[:, :O]


# ----------------------------------------------------------------------------- params
def make_params(key, input_size, embedding_dim, hidden_size, output_size, num_layers):
    """Deterministic xavier_uniform weights / zero biases (matches xavier_init()), the raw
    per-module weights for the reference, and the fused+packed slabs consumed by the kernel."""
    F, E, H, O, L = input_size, embedding_dim, hidden_size, output_size, num_layers
    G = 4 * H

    def xavier(k, out_dim, in_dim):
        bound = math.sqrt(6.0 / (in_dim + out_dim))
        w = jax.random.uniform(k, (out_dim, in_dim), jnp.float32, -bound, bound)
        # store at MXU operand precision so kernel (bf16) and reference (f32) share weights
        return w.T.astype(jnp.bfloat16).astype(jnp.float32)   # (in, out)

    keys = iter(jax.random.split(key, 8 + 2 * L))
    eps = 1e-5
    p = {
        "dims": (F, E, H, O, L),
        # BatchNorm1d (eval): gamma=1, beta=0, running_mean=0, running_var=1
        "bn_scale": jnp.full((1, F), 1.0 / math.sqrt(1.0 + eps), jnp.float32),
        "bn_shift": jnp.zeros((1, F), jnp.float32),
        "we1": xavier(next(keys), E, F), "be1": jnp.zeros((1, E), jnp.float32),
        "we2": xavier(next(keys), E, E), "be2": jnp.zeros((1, E), jnp.float32),
        "wo1": xavier(next(keys), H // 2, H), "bo1": jnp.zeros((1, H // 2), jnp.float32),
        "wo2": xavier(next(keys), O, H // 2), "bo2": jnp.zeros((1, O), jnp.float32),
    }
    for l in range(L):
        in_l = E if l == 0 else H
        p[f"wih{l}"] = xavier(next(keys), G, in_l)
        p[f"whh{l}"] = xavier(next(keys), G, H)
        p[f"b{l}"] = jnp.zeros((1, G), jnp.float32)      # b_ih + b_hh, both zero

    # ---- algebraic fusions (valid because there is no activation between these Linears) ----
    # front: diag(bn_scale)·we1·we2·wih0 and the matching bias chain (+ layer-0 LSTM bias)
    w_front = (p["we1"] * p["bn_scale"].reshape(F, 1)) @ p["we2"] @ p["wih0"]          # (F, 4H)
    b_front = ((p["bn_shift"] @ p["we1"] + p["be1"]) @ p["we2"] + p["be2"]) @ p["wih0"] + p["b0"]
    # wavefront recurrent block weight: diag blocks W_hh_l, super-diag blocks W_ih_{l+1}
    w_rec = jnp.zeros((L * H, L * G), jnp.float32)
    b_rec = jnp.zeros((1, L * G), jnp.float32)            # layer-0 bias already in b_front
    for l in range(L):
        w_rec = w_rec.at[l * H:(l + 1) * H, l * G:(l + 1) * G].set(p[f"whh{l}"])
        if l >= 1:
            w_rec = w_rec.at[(l - 1) * H:l * H, l * G:(l + 1) * G].set(p[f"wih{l}"])
            b_rec = b_rec.at[:, l * G:(l + 1) * G].set(p[f"b{l}"])
    # output head: Linear(H,H/2) ∘ Linear(H/2,O) fused into one (H, O) matmul
    w_out = p["wo1"] @ p["wo2"]
    b_out = p["bo1"] @ p["wo2"] + p["bo2"]

    # ---- pack everything into one bf16 weight slab + one f32 vector slab (2 DMAs) ----------
    offs, total_rows, wlane = _pack_layout(p["dims"])
    w_pack = jnp.zeros((total_rows, wlane), jnp.float32)
    w_pack = w_pack.at[offs["w_front"]:offs["w_front"] + F, :G].set(w_front)
    w_pack = w_pack.at[offs["w_rec"]:offs["w_rec"] + L * H, :L * G].set(w_rec)
    w_pack = w_pack.at[offs["w_out"]:offs["w_out"] + H, :O].set(w_out)
    p["w_pack"] = w_pack.astype(jnp.bfloat16)

    b_pack = jnp.zeros((8, wlane), jnp.float32)            # rows: b_front, b_rec, b_out
    b_pack = b_pack.at[0:1, :G].set(b_front)
    b_pack = b_pack.at[1:2, :L * G].set(b_rec)
    b_pack = b_pack.at[2:3, :O].set(b_out)
    p["b_pack"] = b_pack
    return p


# ----------------------------------------------------------------------------- reference
def reference_forward(p, x, x_len):
    """Pure-JAX f32 reference of the UNFUSED eval-mode forward, for validation."""
    B, T, F = x.shape
    _, E, H, O, L = p["dims"]
    xlen = jnp.clip(x_len.astype(jnp.int32), 1, T)
    xb = x * p["bn_scale"] + p["bn_shift"]
    e = xb @ p["we1"] + p["be1"]
    e = e @ p["we2"] + p["be2"]
    h = [jnp.zeros((B, H)) for _ in range(L)]
    c = [jnp.zeros((B, H)) for _ in range(L)]
    last_h = jnp.zeros((B, H))
    for t in range(T):
        layer_in = e[:, t, :]
        for l in range(L):
            g = layer_in @ p[f"wih{l}"] + h[l] @ p[f"whh{l}"] + p[f"b{l}"]
            i_g = jax.nn.sigmoid(g[:, :H])
            f_g = jax.nn.sigmoid(g[:, H:2 * H])
            g_g = jnp.tanh(g[:, 2 * H:3 * H])
            o_g = jax.nn.sigmoid(g[:, 3 * H:])
            c[l] = f_g * c[l] + i_g * g_g
            h[l] = o_g * jnp.tanh(c[l])
            layer_in = h[l]
        last_h = jnp.where((xlen == (t + 1)).reshape(B, 1), h[L - 1], last_h)
    y = last_h @ p["wo1"] + p["bo1"]
    return y @ p["wo2"] + p["bo2"]


if __name__ == "__main__":
    # Small shapes consistent with the module: batch=8, seq=8, input_size=16,
    # embedding_dim=32, hidden_size=32, output_size=4, num_layers=2.
    B, T, F, E, H, O, L = 8, 8, 16, 32, 32, 4, 2

    key = jax.random.PRNGKey(0)
    kx, kp = jax.random.split(key)
    x = jax.random.normal(kx, (B, T, F), jnp.float32)
    x_len = jnp.array([8, 5, 3, 8, 1, 6, 7, 2], dtype=jnp.int32)

    params = make_params(kp, F, E, H, O, L)

    out = jax.block_until_ready(lstm_forward(params, x, x_len))
    ref = reference_forward(params, x, x_len)

    assert out.shape == (B, O)
    assert jnp.allclose(out, ref, rtol=2e-2, atol=2e-2), "Pallas kernel mismatch vs JAX reference"

    print("KERNEL_OK")
</pallas_src>

<mosaic_0001>
module attributes {stable_mosaic.version = 11 : i64} {
  func.func @kernel(%arg0: memref<8x1xi32, #tpu.memory_space<vmem>>, %arg1: memref<64x16xf32, #tpu.memory_space<vmem>>, %arg2: memref<112x256xbf16, #tpu.memory_space<vmem>>, %arg3: memref<8x256xf32, #tpu.memory_space<vmem>>, %arg4: memref<8x128xf32, #tpu.memory_space<vmem>>, %arg5: memref<8x64xf32, #tpu.memory_space<vmem>>) attributes {dimension_semantics = [], scalar_prefetch = 0 : i64, scratch_operands = 1 : i64, tpu.core_type = #tpu.core_type<tc>} {
    %c0 = arith.constant 0 : index
    %c0_0 = arith.constant 0 : index
    %0 = vector.load %arg2[%c0, %c0_0] : memref<112x256xbf16, #tpu.memory_space<vmem>>, vector<16x128xbf16>
    %c16 = arith.constant 16 : index
    %c0_1 = arith.constant 0 : index
    %1 = vector.load %arg2[%c16, %c0_1] : memref<112x256xbf16, #tpu.memory_space<vmem>>, vector<64x256xbf16>
    %c80 = arith.constant 80 : index
    %c0_2 = arith.constant 0 : index
    %2 = vector.load %arg2[%c80, %c0_2] : memref<112x256xbf16, #tpu.memory_space<vmem>>, vector<32x128xbf16>
    %c0_3 = arith.constant 0 : index
    %c0_4 = arith.constant 0 : index
    %3 = vector.load %arg3[%c0_3, %c0_4] : memref<8x256xf32, #tpu.memory_space<vmem>>, vector<1x128xf32>
    %c1 = arith.constant 1 : index
    %c0_5 = arith.constant 0 : index
    %4 = vector.load %arg3[%c1, %c0_5] : memref<8x256xf32, #tpu.memory_space<vmem>>, vector<1x256xf32>
    %c2 = arith.constant 2 : index
    %c0_6 = arith.constant 0 : index
    %5 = vector.load %arg3[%c2, %c0_6] : memref<8x256xf32, #tpu.memory_space<vmem>>, vector<1x128xf32>
    %c0_7 = arith.constant 0 : index
    %c0_8 = arith.constant 0 : index
    %6 = vector.load %arg0[%c0_7, %c0_8] : memref<8x1xi32, #tpu.memory_space<vmem>>, vector<8x1xi32>
    %c0_9 = arith.constant 0 : index
    %c0_10 = arith.constant 0 : index
    %7 = vector.load %arg1[%c0_9, %c0_10] : memref<64x16xf32, #tpu.memory_space<vmem>>, vector<64x16xf32>
    %8 = arith.truncf %7 : vector<64x16xf32> to vector<64x16xbf16>
    %cst = arith.constant dense<0.000000e+00> : vector<64x128xf32>
    %9 = tpu.matmul %8, %0, %cst {dimension_numbers = #tpu.dot_dimension_numbers<[1], [0], [0], [1], [0, 0, 1, 1], [], []>} : vector<64x16xbf16>, vector<16x128xbf16>, vector<64x128xf32> -> vector<64x128xf32>
    %10 = vector.broadcast %3 : vector<1x128xf32> to vector<64x128xf32>
    %11 = arith.addf %9, %10 : vector<64x128xf32>
    %cst_11 = arith.constant 0.000000e+00 : f32
    %12 = vector.broadcast %cst_11 : f32 to vector<8x64xf32>
    %c0_12 = arith.constant 0 : index
    %c0_13 = arith.constant 0 : index
    %13 = vector.load %arg5[%c0_12, %c0_13] : memref<8x64xf32, #tpu.memory_space<vmem>>, vector<8x64xf32>
    tpu.vector_store %arg5[%c0_12, %c0_13], %12 {strides = array<i32>} : memref<8x64xf32, #tpu.memory_space<vmem>>, vector<8x64xf32>,
    %cst_14 = arith.constant 0.000000e+00 : f32
    %14 = vector.broadcast %cst_14 : f32 to vector<8x32xf32>
    %cst_15 = arith.constant 0.000000e+00 : f32
    %15 = vector.broadcast %cst_15 : f32 to vector<8x32xf32>
    %cst_16 = arith.constant 0.000000e+00 : f32
    %16 = vector.broadcast %cst_16 : f32 to vector<8x32xf32>
    %c0_17 = arith.constant 0 : index
    %c0_18 = arith.constant 0 : index
    %17 = vector.load %arg5[%c0_17, %c0_18] : memref<8x64xf32, #tpu.memory_space<vmem>>, vector<8x64xf32>
    %18 = arith.truncf %17 : vector<8x64xf32> to vector<8x64xbf16>
    %cst_19 = arith.constant dense<0.000000e+00> : vector<8x256xf32>
    %19 = tpu.matmul %18, %1, %cst_19 {dimension_numbers = #tpu.dot_dimension_numbers<[1], [0], [0], [1], [0, 0, 1, 1], [], []>} : vector<8x64xbf16>, vector<64x256xbf16>, vector<8x256xf32> -> vector<8x256xf32>
    %20 = vector.broadcast %4 : vector<1x256xf32> to vector<8x256xf32>
    %21 = arith.addf %19, %20 : vector<8x256xf32>
    %22 = vector.extract_strided_slice %21 {offsets = [0, 0], sizes = [8, 128], strides = [1, 1]} : vector<8x256xf32> to vector<8x128xf32>
    %23 = vector.extract_strided_slice %11 {offsets = [0, 0], sizes = [8, 128], strides = [1, 1]} : vector<64x128xf32> to vector<8x128xf32>
    %24 = arith.addf %22, %23 : vector<8x128xf32>
    %25 = arith.negf %24 : vector<8x128xf32>
    %26 = math.exp %25 : vector<8x128xf32>
    %cst_20 = arith.constant 1.000000e+00 : f32
    %27 = vector.broadcast %cst_20 : f32 to vector<8x128xf32>
    %28 = arith.addf %27, %26 : vector<8x128xf32>
    %29 = arith.divf %27, %28 : vector<8x128xf32>
    %30 = math.tanh %24 : vector<8x128xf32>
    %31 = vector.extract_strided_slice %29 {offsets = [0, 32], sizes = [8, 32], strides = [1, 1]} : vector<8x128xf32> to vector<8x32xf32>
    %32 = arith.mulf %31, %14 : vector<8x32xf32>
    %33 = vector.extract_strided_slice %29 {offsets = [0, 0], sizes = [8, 32], strides = [1, 1]} : vector<8x128xf32> to vector<8x32xf32>
    %34 = vector.extract_strided_slice %30 {offsets = [0, 64], sizes = [8, 32], strides = [1, 1]} : vector<8x128xf32> to vector<8x32xf32>
    %35 = arith.mulf %33, %34 : vector<8x32xf32>
    %36 = arith.addf %32, %35 : vector<8x32xf32>
    %37 = vector.extract_strided_slice %29 {offsets = [0, 96], sizes = [8, 32], strides = [1, 1]} : vector<8x128xf32> to vector<8x32xf32>
    %38 = math.tanh %36 : vector<8x32xf32>
    %39 = arith.mulf %37, %38 : vector<8x32xf32>
    %c0_21 = arith.constant 0 : index
    %c0_22 = arith.constant 0 : index
    %40 = vector.load %arg5[%c0_21, %c0_22] : memref<8x64xf32, #tpu.memory_space<vmem>>, vector<8x32xf32>
    tpu.vector_store %arg5[%c0_21, %c0_22], %39 {strides = array<i32>} : memref<8x64xf32, #tpu.memory_space<vmem>>, vector<8x32xf32>,
    %c0_23 = arith.constant 0 : index
    %c0_24 = arith.constant 0 : index
    %41 = vector.load %arg5[%c0_23, %c0_24] : memref<8x64xf32, #tpu.memory_space<vmem>>, vector<8x64xf32>
    %42 = arith.truncf %41 : vector<8x64xf32> to vector<8x64xbf16>
    %cst_25 = arith.constant dense<0.000000e+00> : vector<8x256xf32>
    %43 = tpu.matmul %42, %1, %cst_25 {dimension_numbers = #tpu.dot_dimension_numbers<[1], [0], [0], [1], [0, 0, 1, 1], [], []>} : vector<8x64xbf16>, vector<64x256xbf16>, vector<8x256xf32> -> vector<8x256xf32>
    %44 = vector.broadcast %4 : vector<1x256xf32> to vector<8x256xf32>
    %45 = arith.addf %43, %44 : vector<8x256xf32>
    %46 = vector.extract_strided_slice %45 {offsets = [0, 0], sizes = [8, 128], strides = [1, 1]} : vector<8x256xf32> to vector<8x128xf32>
    %47 = vector.extract_strided_slice %11 {offsets = [8, 0], sizes = [8, 128], strides = [1, 1]} : vector<64x128xf32> to vector<8x128xf32>
    %48 = arith.addf %46, %47 : vector<8x128xf32>
    %49 = arith.negf %48 : vector<8x128xf32>
    %50 = math.exp %49 : vector<8x128xf32>
    %cst_26 = arith.constant 1.000000e+00 : f32
    %51 = vector.broadcast %cst_26 : f32 to vector<8x128xf32>
    %52 = arith.addf %51, %50 : vector<8x128xf32>
    %53 = arith.divf %51, %52 : vector<8x128xf32>
    %54 = math.tanh %48 : vector<8x128xf32>
    %55 = vector.extract_strided_slice %53 {offsets = [0, 32], sizes = [8, 32], strides = [1, 1]} : vector<8x128xf32> to vector<8x32xf32>
    %56 = arith.mulf %55, %36 : vector<8x32xf32>
    %57 = vector.extract_strided_slice %53 {offsets = [0, 0], sizes = [8, 32], strides = [1, 1]} : vector<8x128xf32> to vector<8x32xf32>
    %58 = vector.extract_strided_slice %54 {offsets = [0, 64], sizes = [8, 32], strides = [1, 1]} : vector<8x128xf32> to vector<8x32xf32>
    %59 = arith.mulf %57, %58 : vector<8x32xf32>
    %60 = arith.addf %56, %59 : vector<8x32xf32>
    %61 = vector.extract_strided_slice %53 {offsets = [0, 96], sizes = [8, 32], strides = [1, 1]} : vector<8x128xf32> to vector<8x32xf32>
    %62 = math.tanh %60 : vector<8x32xf32>
    %63 = arith.mulf %61, %62 : vector<8x32xf32>
    %c0_27 = arith.constant 0 : index
    %c0_28 = arith.constant 0 : index
    %64 = vector.load %arg5[%c0_27, %c0_28] : memref<8x64xf32, #tpu.memory_space<vmem>>, vector<8x32xf32>
    tpu.vector_store %arg5[%c0_27, %c0_28], %63 {strides = array<i32>} : memref<8x64xf32, #tpu.memory_space<vmem>>, vector<8x32xf32>,
    %65 = vector.extract_strided_slice %45 {offsets = [0, 128], sizes = [8, 128], strides = [1, 1]} : vector<8x256xf32> to vector<8x128xf32>
    %66 = arith.negf %65 : vector<8x128xf32>
    %67 = math.exp %66 : vector<8x128xf32>
    %cst_29 = arith.constant 1.000000e+00 : f32
    %68 = vector.broadcast %cst_29 : f32 to vector<8x128xf32>
    %69 = arith.addf %68, %67 : vector<8x128xf32>
    %70 = arith.divf %68, %69 : vector<8x128xf32>
    %71 = math.tanh %65 : vector<8x128xf32>
    %72 = vector.extract_strided_slice %70 {offsets = [0, 32], sizes = [8, 32], strides = [1, 1]} : vector<8x128xf32> to vector<8x32xf32>
    %73 = arith.mulf %72, %15 : vector<8x32xf32>
    %74 = vector.extract_strided_slice %70 {offsets = [0, 0], sizes = [8, 32], strides = [1, 1]} : vector<8x128xf32> to vector<8x32xf32>
    %75 = vector.extract_strided_slice %71 {offsets = [0, 64], sizes = [8, 32], strides = [1, 1]} : vector<8x128xf32> to vector<8x32xf32>
    %76 = arith.mulf %74, %75 : vector<8x32xf32>
    %77 = arith.addf %73, %76 : vector<8x32xf32>
    %78 = vector.extract_strided_slice %70 {offsets = [0, 96], sizes = [8, 32], strides = [1, 1]} : vector<8x128xf32> to vector<8x32xf32>
    %79 = math.tanh %77 : vector<8x32xf32>
    %80 = arith.mulf %78, %79 : vector<8x32xf32>
    %c0_30 = arith.constant 0 : index
    %c32 = arith.constant 32 : index
    %81 = vector.load %arg5[%c0_30, %c32] : memref<8x64xf32, #tpu.memory_space<vmem>>, vector<8x32xf32>
    tpu.vector_store %arg5[%c0_30, %c32], %80 {strides = array<i32>} : memref<8x64xf32, #tpu.memory_space<vmem>>, vector<8x32xf32>,
    %c1_i32 = arith.constant 1 : i32
    %82 = vector.broadcast %c1_i32 : i32 to vector<8x1xi32>
    %83 = arith.cmpi eq, %6, %82 : vector<8x1xi32>
    %84 = vector.shape_cast %83 : vector<8x1xi1> to vector<8x1xi1>
    %85 = vector.broadcast %84 : vector<8x1xi1> to vector<8x32xi1>
    %86 = arith.select %85, %80, %16 : vector<8x32xi1>, vector<8x32xf32>
    %c0_31 = arith.constant 0 : index
    %c0_32 = arith.constant 0 : index
    %87 = vector.load %arg5[%c0_31, %c0_32] : memref<8x64xf32, #tpu.memory_space<vmem>>, vector<8x64xf32>
    %88 = arith.truncf %87 : vector<8x64xf32> to vector<8x64xbf16>
    %cst_33 = arith.constant dense<0.000000e+00> : vector<8x256xf32>
    %89 = tpu.matmul %88, %1, %cst_33 {dimension_numbers = #tpu.dot_dimension_numbers<[1], [0], [0], [1], [0, 0, 1, 1], [], []>} : vector<8x64xbf16>, vector<64x256xbf16>, vector<8x256xf32> -> vector<8x256xf32>
    %90 = vector.broadcast %4 : vector<1x256xf32> to vector<8x256xf32>
    %91 = arith.addf %89, %90 : vector<8x256xf32>
    %92 = vector.extract_strided_slice %91 {offsets = [0, 0], sizes = [8, 128], strides = [1, 1]} : vector<8x256xf32> to vector<8x128xf32>
    %93 = vector.extract_strided_slice %11 {offsets = [16, 0], sizes = [8, 128], strides = [1, 1]} : vector<64x128xf32> to vector<8x128xf32>
    %94 = arith.addf %92, %93 : vector<8x128xf32>
    %95 = arith.negf %94 : vector<8x128xf32>
    %96 = math.exp %95 : vector<8x128xf32>
    %cst_34 = arith.constant 1.000000e+00 : f32
    %97 = vector.broadcast %cst_34 : f32 to vector<8x128xf32>
    %98 = arith.addf %97, %96 : vector<8x128xf32>
    %99 = arith.divf %97, %98 : vector<8x128xf32>
    %100 = math.tanh %94 : vector<8x128xf32>
    %101 = vector.extract_strided_slice %99 {offsets = [0, 32], sizes = [8, 32], strides = [1, 1]} : vector<8x128xf32> to vector<8x32xf32>
    %102 = arith.mulf %101, %60 : vector<8x32xf32>
    %103 = vector.extract_strided_slice %99 {offsets = [0, 0], sizes = [8, 32], strides = [1, 1]} : vector<8x128xf32> to vector<8x32xf32>
    %104 = vector.extract_strided_slice %100 {offsets = [0, 64], sizes = [8, 32], strides = [1, 1]} : vector<8x128xf32> to vector<8x32xf32>
    %105 = arith.mulf %103, %104 : vector<8x32xf32>
    %106 = arith.addf %102, %105 : vector<8x32xf32>
    %107 = vector.extract_strided_slice %99 {offsets = [0, 96], sizes = [8, 32], strides = [1, 1]} : vector<8x128xf32> to vector<8x32xf32>
    %108 = math.tanh %106 : vector<8x32xf32>
    %109 = arith.mulf %107, %108 : vector<8x32xf32>
    %c0_35 = arith.constant 0 : index
    %c0_36 = arith.constant 0 : index
    %110 = vector.load %arg5[%c0_35, %c0_36] : memref<8x64xf32, #tpu.memory_space<vmem>>, vector<8x32xf32>
    tpu.vector_store %arg5[%c0_35, %c0_36], %109 {strides = array<i32>} : memref<8x64xf32, #tpu.memory_space<vmem>>, vector<8x32xf32>,
    %111 = vector.extract_strided_slice %91 {offsets = [0, 128], sizes = [8, 128], strides = [1, 1]} : vector<8x256xf32> to vector<8x128xf32>
    %112 = arith.negf %111 : vector<8x128xf32>
    %113 = math.exp %112 : vector<8x128xf32>
    %cst_37 = arith.constant 1.000000e+00 : f32
    %114 = vector.broadcast %cst_37 : f32 to vector<8x128xf32>
    %115 = arith.addf %114, %113 : vector<8x128xf32>
    %116 = arith.divf %114, %115 : vector<8x128xf32>
    %117 = math.tanh %111 : vector<8x128xf32>
    %118 = vector.extract_strided_slice %116 {offsets = [0, 32], sizes = [8, 32], strides = [1, 1]} : vector<8x128xf32> to vector<8x32xf32>
    %119 = arith.mulf %118, %77 : vector<8x32xf32>
    %120 = vector.extract_strided_slice %116 {offsets = [0, 0], sizes = [8, 32], strides = [1, 1]} : vector<8x128xf32> to vector<8x32xf32>
    %121 = vector.extract_strided_slice %117 {offsets = [0, 64], sizes = [8, 32], strides = [1, 1]} : vector<8x128xf32> to vector<8x32xf32>
    %122 = arith.mulf %120, %121 : vector<8x32xf32>
    %123 = arith.addf %119, %122 : vector<8x32xf32>
    %124 = vector.extract_strided_slice %116 {offsets = [0, 96], sizes = [8, 32], strides = [1, 1]} : vector<8x128xf32> to vector<8x32xf32>
    %125 = math.tanh %123 : vector<8x32xf32>
    %126 = arith.mulf %124, %125 : vector<8x32xf32>
    %c0_38 = arith.constant 0 : index
    %c32_39 = arith.constant 32 : index
    %127 = vector.load %arg5[%c0_38, %c32_39] : memref<8x64xf32, #tpu.memory_space<vmem>>, vector<8x32xf32>
    tpu.vector_store %arg5[%c0_38, %c32_39], %126 {strides = array<i32>} : memref<8x64xf32, #tpu.memory_space<vmem>>, vector<8x32xf32>,
    %c2_i32 = arith.constant 2 : i32
    %128 = vector.broadcast %c2_i32 : i32 to vector<8x1xi32>
    %129 = arith.cmpi eq, %6, %128 : vector<8x1xi32>
    %130 = vector.shape_cast %129 : vector<8x1xi1> to vector<8x1xi1>
    %131 = vector.broadcast %130 : vector<8x1xi1> to vector<8x32xi1>
    %132 = arith.select %131, %126, %86 : vector<8x32xi1>, vector<8x32xf32>
    %c0_40 = arith.constant 0 : index
    %c0_41 = arith.constant 0 : index
    %133 = vector.load %arg5[%c0_40, %c0_41] : memref<8x64xf32, #tpu.memory_space<vmem>>, vector<8x64xf32>
    %134 = arith.truncf %133 : vector<8x64xf32> to vector<8x64xbf16>
    %cst_42 = arith.constant dense<0.000000e+00> : vector<8x256xf32>
    %135 = tpu.matmul %134, %1, %cst_42 {dimension_numbers = #tpu.dot_dimension_numbers<[1], [0], [0], [1], [0, 0, 1, 1], [], []>} : vector<8x64xbf16>, vector<64x256xbf16>, vector<8x256xf32> -> vector<8x256xf32>
    %136 = vector.broadcast %4 : vector<1x256xf32> to vector<8x256xf32>
    %137 = arith.addf %135, %136 : vector<8x256xf32>
    %138 = vector.extract_strided_slice %137 {offsets = [0, 0], sizes = [8, 128], strides = [1, 1]} : vector<8x256xf32> to vector<8x128xf32>
    %139 = vector.extract_strided_slice %11 {offsets = [24, 0], sizes = [8, 128], strides = [1, 1]} : vector<64x128xf32> to vector<8x128xf32>
    %140 = arith.addf %138, %139 : vector<8x128xf32>
    %141 = arith.negf %140 : vector<8x128xf32>
    %142 = math.exp %141 : vector<8x128xf32>
    %cst_43 = arith.constant 1.000000e+00 : f32
    %143 = vector.broadcast %cst_43 : f32 to vector<8x128xf32>
    %144 = arith.addf %143, %142 : vector<8x128xf32>
    %145 = arith.divf %143, %144 : vector<8x128xf32>
    %146 = math.tanh %140 : vector<8x128xf32>
    %147 = vector.extract_strided_slice %145 {offsets = [0, 32], sizes = [8, 32], strides = [1, 1]} : vector<8x128xf32> to vector<8x32xf32>
    %148 = arith.mulf %147, %106 : vector<8x32xf32>
    %149 = vector.extract_strided_slice %145 {offsets = [0, 0], sizes = [8, 32], strides = [1, 1]} : vector<8x128xf32> to vector<8x32xf32>
    %150 = vector.extract_strided_slice %146 {offsets = [0, 64], sizes = [8, 32], strides = [1, 1]} : vector<8x128xf32> to vector<8x32xf32>
    %151 = arith.mulf %149, %150 : vector<8x32xf32>
    %152 = arith.addf %148, %151 : vector<8x32xf32>
    %153 = vector.extract_strided_slice %145 {offsets = [0, 96], sizes = [8, 32], strides = [1, 1]} : vector<8x128xf32> to vector<8x32xf32>
    %154 = math.tanh %152 : vector<8x32xf32>
    %155 = arith.mulf %153, %154 : vector<8x32xf32>
    %c0_44 = arith.constant 0 : index
    %c0_45 = arith.constant 0 : index
    %156 = vector.load %arg5[%c0_44, %c0_45] : memref<8x64xf32, #tpu.memory_space<vmem>>, vector<8x32xf32>
    tpu.vector_store %arg5[%c0_44, %c0_45], %155 {strides = array<i32>} : memref<8x64xf32, #tpu.memory_space<vmem>>, vector<8x32xf32>,
    %157 = vector.extract_strided_slice %137 {offsets = [0, 128], sizes = [8, 128], strides = [1, 1]} : vector<8x256xf32> to vector<8x128xf32>
    %158 = arith.negf %157 : vector<8x128xf32>
    %159 = math.exp %158 : vector<8x128xf32>
    %cst_46 = arith.constant 1.000000e+00 : f32
    %160 = vector.broadcast %cst_46 : f32 to vector<8x128xf32>
    %161 = arith.addf %160, %159 : vector<8x128xf32>
    %162 = arith.divf %160, %161 : vector<8x128xf32>
    %163 = math.tanh %157 : vector<8x128xf32>
    %164 = vector.extract_strided_slice %162 {offsets = [0, 32], sizes = [8, 32], strides = [1, 1]} : vector<8x128xf32> to vector<8x32xf32>
    %165 = arith.mulf %164, %123 : vector<8x32xf32>
    %166 = vector.extract_strided_slice %162 {offsets = [0, 0], sizes = [8, 32], strides = [1, 1]} : vector<8x128xf32> to vector<8x32xf32>
    %167 = vector.extract_strided_slice %163 {offsets = [0, 64], sizes = [8, 32], strides = [1, 1]} : vector<8x128xf32> to vector<8x32xf32>
    %168 = arith.mulf %166, %167 : vector<8x32xf32>
    %169 = arith.addf %165, %168 : vector<8x32xf32>
    %170 = vector.extract_strided_slice %162 {offsets = [0, 96], sizes = [8, 32], strides = [1, 1]} : vector<8x128xf32> to vector<8x32xf32>
    %171 = math.tanh %169 : vector<8x32xf32>
    %172 = arith.mulf %170, %171 : vector<8x32xf32>
    %c0_47 = arith.constant 0 : index
    %c32_48 = arith.constant 32 : index
    %173 = vector.load %arg5[%c0_47, %c32_48] : memref<8x64xf32, #tpu.memory_space<vmem>>, vector<8x32xf32>
    tpu.vector_store %arg5[%c0_47, %c32_48], %172 {strides = array<i32>} : memref<8x64xf32, #tpu.memory_space<vmem>>, vector<8x32xf32>,
    %c3_i32 = arith.constant 3 : i32
    %174 = vector.broadcast %c3_i32 : i32 to vector<8x1xi32>
    %175 = arith.cmpi eq, %6, %174 : vector<8x1xi32>
    %176 = vector.shape_cast %175 : vector<8x1xi1> to vector<8x1xi1>
    %177 = vector.broadcast %176 : vector<8x1xi1> to vector<8x32xi1>
    %178 = arith.select %177, %172, %132 : vector<8x32xi1>, vector<8x32xf32>
    %c0_49 = arith.constant 0 : index
    %c0_50 = arith.constant 0 : index
    %179 = vector.load %arg5[%c0_49, %c0_50] : memref<8x64xf32, #tpu.memory_space<vmem>>, vector<8x64xf32>
    %180 = arith.truncf %179 : vector<8x64xf32> to vector<8x64xbf16>
    %cst_51 = arith.constant dense<0.000000e+00> : vector<8x256xf32>
    %181 = tpu.matmul %180, %1, %cst_51 {dimension_numbers = #tpu.dot_dimension_numbers<[1], [0], [0], [1], [0, 0, 1, 1], [], []>} : vector<8x64xbf16>, vector<64x256xbf16>, vector<8x256xf32> -> vector<8x256xf32>
    %182 = vector.broadcast %4 : vector<1x256xf32> to vector<8x256xf32>
    %183 = arith.addf %181, %182 : vector<8x256xf32>
    %184 = vector.extract_strided_slice %183 {offsets = [0, 0], sizes = [8, 128], strides = [1, 1]} : vector<8x256xf32> to vector<8x128xf32>
    %185 = vector.extract_strided_slice %11 {offsets = [32, 0], sizes = [8, 128], strides = [1, 1]} : vector<64x128xf32> to vector<8x128xf32>
    %186 = arith.addf %184, %185 : vector<8x128xf32>
    %187 = arith.negf %186 : vector<8x128xf32>
    %188 = math.exp %187 : vector<8x128xf32>
    %cst_52 = arith.constant 1.000000e+00 : f32
    %189 = vector.broadcast %cst_52 : f32 to vector<8x128xf32>
    %190 = arith.addf %189, %188 : vector<8x128xf32>
    %191 = arith.divf %189, %190 : vector<8x128xf32>
    %192 = math.tanh %186 : vector<8x128xf32>
    %193 = vector.extract_strided_slice %191 {offsets = [0, 32], sizes = [8, 32], strides = [1, 1]} : vector<8x128xf32> to vector<8x32xf32>
    %194 = arith.mulf %193, %152 : vector<8x32xf32>
    %195 = vector.extract_strided_slice %191 {offsets = [0, 0], sizes = [8, 32], strides = [1, 1]} : vector<8x128xf32> to vector<8x32xf32>
    %196 = vector.extract_strided_slice %192 {offsets = [0, 64], sizes = [8, 32], strides = [1, 1]} : vector<8x128xf32> to vector<8x32xf32>
    %197 = arith.mulf %195, %196 : vector<8x32xf32>
    %198 = arith.addf %194, %197 : vector<8x32xf32>
    %199 = vector.extract_strided_slice %191 {offsets = [0, 96], sizes = [8, 32], strides = [1, 1]} : vector<8x128xf32> to vector<8x32xf32>
    %200 = math.tanh %198 : vector<8x32xf32>
    %201 = arith.mulf %199, %200 : vector<8x32xf32>
    %c0_53 = arith.constant 0 : index
    %c0_54 = arith.constant 0 : index
    %202 = vector.load %arg5[%c0_53, %c0_54] : memref<8x64xf32, #tpu.memory_space<vmem>>, vector<8x32xf32>
    tpu.vector_store %arg5[%c0_53, %c0_54], %201 {strides = array<i32>} : memref<8x64xf32, #tpu.memory_space<vmem>>, vector<8x32xf32>,
    %203 = vector.extract_strided_slice %183 {offsets = [0, 128], sizes = [8, 128], strides = [1, 1]} : vector<8x256xf32> to vector<8x128xf32>
    %204 = arith.negf %203 : vector<8x128xf32>
    %205 = math.exp %204 : vector<8x128xf32>
    %cst_55 = arith.constant 1.000000e+00 : f32
    %206 = vector.broadcast %cst_55 : f32 to vector<8x128xf32>
    %207 = arith.addf %206, %205 : vector<8x128xf32>
    %208 = arith.divf %206, %207 : vector<8x128xf32>
    %209 = math.tanh %203 : vector<8x128xf32>
    %210 = vector.extract_strided_slice %208 {offsets = [0, 32], sizes = [8, 32], strides = [1, 1]} : vector<8x128xf32> to vector<8x32xf32>
    %211 = arith.mulf %210, %169 : vector<8x32xf32>
    %212 = vector.extract_strided_slice %208 {offsets = [0, 0], sizes = [8, 32], strides = [1, 1]} : vector<8x128xf32> to vector<8x32xf32>
    %213 = vector.extract_strided_slice %209 {offsets = [0, 64], sizes = [8, 32], strides = [1, 1]} : vector<8x128xf32> to vector<8x32xf32>
    %214 = arith.mulf %212, %213 : vector<8x32xf32>
    %215 = arith.addf %211, %214 : vector<8x32xf32>
    %216 = vector.extract_strided_slice %208 {offsets = [0, 96], sizes = [8, 32], strides = [1, 1]} : vector<8x128xf32> to vector<8x32xf32>
    %217 = math.tanh %215 : vector<8x32xf32>
    %218 = arith.mulf %216, %217 : vector<8x32xf32>
    %c0_56 = arith.constant 0 : index
    %c32_57 = arith.constant 32 : index
    %219 = vector.load %arg5[%c0_56, %c32_57] : memref<8x64xf32, #tpu.memory_space<vmem>>, vector<8x32xf32>
    tpu.vector_store %arg5[%c0_56, %c32_57], %218 {strides = array<i32>} : memref<8x64xf32, #tpu.memory_space<vmem>>, vector<8x32xf32>,
    %c4_i32 = arith.constant 4 : i32
    %220 = vector.broadcast %c4_i32 : i32 to vector<8x1xi32>
    %221 = arith.cmpi eq, %6, %220 : vector<8x1xi32>
    %222 = vector.shape_cast %221 : vector<8x1xi1> to vector<8x1xi1>
    %223 = vector.broadcast %222 : vector<8x1xi1> to vector<8x32xi1>
    %224 = arith.select %223, %218, %178 : vector<8x32xi1>, vector<8x32xf32>
    %c0_58 = arith.constant 0 : index
    %c0_59 = arith.constant 0 : index
    %225 = vector.load %arg5[%c0_58, %c0_59] : memref<8x64xf32, #tpu.memory_space<vmem>>, vector<8x64xf32>
    %226 = arith.truncf %225 : vector<8x64xf32> to vector<8x64xbf16>
    %cst_60 = arith.constant dense<0.000000e+00> : vector<8x256xf32>
    %227 = tpu.matmul %226, %1, %cst_60 {dimension_numbers = #tpu.dot_dimension_numbers<[1], [0], [0], [1], [0, 0, 1, 1], [], []>} : vector<8x64xbf16>, vector<64x256xbf16>, vector<8x256xf32> -> vector<8x256xf32>
    %228 = vector.broadcast %4 : vector<1x256xf32> to vector<8x256xf32>
    %229 = arith.addf %227, %228 : vector<8x256xf32>
    %230 = vector.extract_strided_slice %229 {offsets = [0, 0], sizes = [8, 128], strides = [1, 1]} : vector<8x256xf32> to vector<8x128xf32>
    %231 = vector.extract_strided_slice %11 {offsets = [40, 0], sizes = [8, 128], strides = [1, 1]} : vector<64x128xf32> to vector<8x128xf32>
    %232 = arith.addf %230, %231 : vector<8x128xf32>
    %233 = arith.negf %232 : vector<8x128xf32>
    %234 = math.exp %233 : vector<8x128xf32>
    %cst_61 = arith.constant 1.000000e+00 : f32
    %235 = vector.broadcast %cst_61 : f32 to vector<8x128xf32>
    %236 = arith.addf %235, %234 : vector<8x128xf32>
    %237 = arith.divf %235, %236 : vector<8x128xf32>
    %238 = math.tanh %232 : vector<8x128xf32>
    %239 = vector.extract_strided_slice %237 {offsets = [0, 32], sizes = [8, 32], strides = [1, 1]} : vector<8x128xf32> to vector<8x32xf32>
    %240 = arith.mulf %239, %198 : vector<8x32xf32>
    %241 = vector.extract_strided_slice %237 {offsets = [0, 0], sizes = [8, 32], strides = [1, 1]} : vector<8x128xf32> to vector<8x32xf32>
    %242 = vector.extract_strided_slice %238 {offsets = [0, 64], sizes = [8, 32], strides = [1, 1]} : vector<8x128xf32> to vector<8x32xf32>
    %243 = arith.mulf %241, %242 : vector<8x32xf32>
    %244 = arith.addf %240, %243 : vector<8x32xf32>
    %245 = vector.extract_strided_slice %237 {offsets = [0, 96], sizes = [8, 32], strides = [1, 1]} : vector<8x128xf32> to vector<8x32xf32>
    %246 = math.tanh %244 : vector<8x32xf32>
    %247 = arith.mulf %245, %246 : vector<8x32xf32>
    %c0_62 = arith.constant 0 : index
    %c0_63 = arith.constant 0 : index
    %248 = vector.load %arg5[%c0_62, %c0_63] : memref<8x64xf32, #tpu.memory_space<vmem>>, vector<8x32xf32>
    tpu.vector_store %arg5[%c0_62, %c0_63], %247 {strides = array<i32>} : memref<8x64xf32, #tpu.memory_space<vmem>>, vector<8x32xf32>,
    %249 = vector.extract_strided_slice %229 {offsets = [0, 128], sizes = [8, 128], strides = [1, 1]} : vector<8x256xf32> to vector<8x128xf32>
    %250 = arith.negf %249 : vector<8x128xf32>
    %251 = math.exp %250 : vector<8x128xf32>
    %cst_64 = arith.constant 1.000000e+00 : f32
    %252 = vector.broadcast %cst_64 : f32 to vector<8x128xf32>
    %253 = arith.addf %252, %251 : vector<8x128xf32>
    %254 = arith.divf %252, %253 : vector<8x128xf32>
    %255 = math.tanh %249 : vector<8x128xf32>
    %256 = vector.extract_strided_slice %254 {offsets = [0, 32], sizes = [8, 32], strides = [1, 1]} : vector<8x128xf32> to vector<8x32xf32>
    %257 = arith.mulf %256, %215 : vector<8x32xf32>
    %258 = vector.extract_strided_slice %254 {offsets = [0, 0], sizes = [8, 32], strides = [1, 1]} : vector<8x128xf32> to vector<8x32xf32>
    %259 = vector.extract_strided_slice %255 {offsets = [0, 64], sizes = [8, 32], strides = [1, 1]} : vector<8x128xf32> to vector<8x32xf32>
    %260 = arith.mulf %258, %259 : vector<8x32xf32>
    %261 = arith.addf %257, %260 : vector<8x32xf32>
    %262 = vector.extract_strided_slice %254 {offsets = [0, 96], sizes = [8, 32], strides = [1, 1]} : vector<8x128xf32> to vector<8x32xf32>
    %263 = math.tanh %261 : vector<8x32xf32>
    %264 = arith.mulf %262, %263 : vector<8x32xf32>
    %c0_65 = arith.constant 0 : index
    %c32_66 = arith.constant 32 : index
    %265 = vector.load %arg5[%c0_65, %c32_66] : memref<8x64xf32, #tpu.memory_space<vmem>>, vector<8x32xf32>
    tpu.vector_store %arg5[%c0_65, %c32_66], %264 {strides = array<i32>} : memref<8x64xf32, #tpu.memory_space<vmem>>, vector<8x32xf32>,
    %c5_i32 = arith.constant 5 : i32
    %266 = vector.broadcast %c5_i32 : i32 to vector<8x1xi32>
    %267 = arith.cmpi eq, %6, %266 : vector<8x1xi32>
    %268 = vector.shape_cast %267 : vector<8x1xi1> to vector<8x1xi1>
    %269 = vector.broadcast %268 : vector<8x1xi1> to vector<8x32xi1>
    %270 = arith.select %269, %264, %224 : vector<8x32xi1>, vector<8x32xf32>
    %c0_67 = arith.constant 0 : index
    %c0_68 = arith.constant 0 : index
    %271 = vector.load %arg5[%c0_67, %c0_68] : memref<8x64xf32, #tpu.memory_space<vmem>>, vector<8x64xf32>
    %272 = arith.truncf %271 : vector<8x64xf32> to vector<8x64xbf16>
    %cst_69 = arith.constant dense<0.000000e+00> : vector<8x256xf32>
    %273 = tpu.matmul %272, %1, %cst_69 {dimension_numbers = #tpu.dot_dimension_numbers<[1], [0], [0], [1], [0, 0, 1, 1], [], []>} : vector<8x64xbf16>, vector<64x256xbf16>, vector<8x256xf32> -> vector<8x256xf32>
    %274 = vector.broadcast %4 : vector<1x256xf32> to vector<8x256xf32>
    %275 = arith.addf %273, %274 : vector<8x256xf32>
    %276 = vector.extract_strided_slice %275 {offsets = [0, 0], sizes = [8, 128], strides = [1, 1]} : vector<8x256xf32> to vector<8x128xf32>
    %277 = vector.extract_strided_slice %11 {offsets = [48, 0], sizes = [8, 128], strides = [1, 1]} : vector<64x128xf32> to vector<8x128xf32>
    %278 = arith.addf %276, %277 : vector<8x128xf32>
    %279 = arith.negf %278 : vector<8x128xf32>
    %280 = math.exp %279 : vector<8x128xf32>
    %cst_70 = arith.constant 1.000000e+00 : f32
    %281 = vector.broadcast %cst_70 : f32 to vector<8x128xf32>
    %282 = arith.addf %281, %280 : vector<8x128xf32>
    %283 = arith.divf %281, %282 : vector<8x128xf32>
    %284 = math.tanh %278 : vector<8x128xf32>
    %285 = vector.extract_strided_slice %283 {offsets = [0, 32], sizes = [8, 32], strides = [1, 1]} : vector<8x128xf32> to vector<8x32xf32>
    %286 = arith.mulf %285, %244 : vector<8x32xf32>
    %287 = vector.extract_strided_slice %283 {offsets = [0, 0], sizes = [8, 32], strides = [1, 1]} : vector<8x128xf32> to vector<8x32xf32>
    %288 = vector.extract_strided_slice %284 {offsets = [0, 64], sizes = [8, 32], strides = [1, 1]} : vector<8x128xf32> to vector<8x32xf32>
    %289 = arith.mulf %287, %288 : vector<8x32xf32>
    %290 = arith.addf %286, %289 : vector<8x32xf32>
    %291 = vector.extract_strided_slice %283 {offsets = [0, 96], sizes = [8, 32], strides = [1, 1]} : vector<8x128xf32> to vector<8x32xf32>
    %292 = math.tanh %290 : vector<8x32xf32>
    %293 = arith.mulf %291, %292 : vector<8x32xf32>
    %c0_71 = arith.constant 0 : index
    %c0_72 = arith.constant 0 : index
    %294 = vector.load %arg5[%c0_71, %c0_72] : memref<8x64xf32, #tpu.memory_space<vmem>>, vector<8x32xf32>
    tpu.vector_store %arg5[%c0_71, %c0_72], %293 {strides = array<i32>} : memref<8x64xf32, #tpu.memory_space<vmem>>, vector<8x32xf32>,
    %295 = vector.extract_strided_slice %275 {offsets = [0, 128], sizes = [8, 128], strides = [1, 1]} : vector<8x256xf32> to vector<8x128xf32>
    %296 = arith.negf %295 : vector<8x128xf32>
    %297 = math.exp %296 : vector<8x128xf32>
    %cst_73 = arith.constant 1.000000e+00 : f32
    %298 = vector.broadcast %cst_73 : f32 to vector<8x128xf32>
    %299 = arith.addf %298, %297 : vector<8x128xf32>
    %300 = arith.divf %298, %299 : vector<8x128xf32>
    %301 = math.tanh %295 : vector<8x128xf32>
    %302 = vector.extract_strided_slice %300 {offsets = [0, 32], sizes = [8, 32], strides = [1, 1]} : vector<8x128xf32> to vector<8x32xf32>
    %303 = arith.mulf %302, %261 : vector<8x32xf32>
    %304 = vector.extract_strided_slice %300 {offsets = [0, 0], sizes = [8, 32], strides = [1, 1]} : vector<8x128xf32> to vector<8x32xf32>
    %305 = vector.extract_strided_slice %301 {offsets = [0, 64], sizes = [8, 32], strides = [1, 1]} : vector<8x128xf32> to vector<8x32xf32>
    %306 = arith.mulf %304, %305 : vector<8x32xf32>
    %307 = arith.addf %303, %306 : vector<8x32xf32>
    %308 = vector.extract_strided_slice %300 {offsets = [0, 96], sizes = [8, 32], strides = [1, 1]} : vector<8x128xf32> to vector<8x32xf32>
    %309 = math.tanh %307 : vector<8x32xf32>
    %310 = arith.mulf %308, %309 : vector<8x32xf32>
    %c0_74 = arith.constant 0 : index
    %c32_75 = arith.constant 32 : index
    %311 = vector.load %arg5[%c0_74, %c32_75] : memref<8x64xf32, #tpu.memory_space<vmem>>, vector<8x32xf32>
    tpu.vector_store %arg5[%c0_74, %c32_75], %310 {strides = array<i32>} : memref<8x64xf32, #tpu.memory_space<vmem>>, vector<8x32xf32>,
    %c6_i32 = arith.constant 6 : i32
    %312 = vector.broadcast %c6_i32 : i32 to vector<8x1xi32>
    %313 = arith.cmpi eq, %6, %312 : vector<8x1xi32>
    %314 = vector.shape_cast %313 : vector<8x1xi1> to vector<8x1xi1>
    %315 = vector.broadcast %314 : vector<8x1xi1> to vector<8x32xi1>
    %316 = arith.select %315, %310, %270 : vector<8x32xi1>, vector<8x32xf32>
    %c0_76 = arith.constant 0 : index
    %c0_77 = arith.constant 0 : index
    %317 = vector.load %arg5[%c0_76, %c0_77] : memref<8x64xf32, #tpu.memory_space<vmem>>, vector<8x64xf32>
    %318 = arith.truncf %317 : vector<8x64xf32> to vector<8x64xbf16>
    %cst_78 = arith.constant dense<0.000000e+00> : vector<8x256xf32>
    %319 = tpu.matmul %318, %1, %cst_78 {dimension_numbers = #tpu.dot_dimension_numbers<[1], [0], [0], [1], [0, 0, 1, 1], [], []>} : vector<8x64xbf16>, vector<64x256xbf16>, vector<8x256xf32> -> vector<8x256xf32>
    %320 = vector.broadcast %4 : vector<1x256xf32> to vector<8x256xf32>
    %321 = arith.addf %319, %320 : vector<8x256xf32>
    %322 = vector.extract_strided_slice %321 {offsets = [0, 0], sizes = [8, 128], strides = [1, 1]} : vector<8x256xf32> to vector<8x128xf32>
    %323 = vector.extract_strided_slice %11 {offsets = [56, 0], sizes = [8, 128], strides = [1, 1]} : vector<64x128xf32> to vector<8x128xf32>
    %324 = arith.addf %322, %323 : vector<8x128xf32>
    %325 = arith.negf %324 : vector<8x128xf32>
    %326 = math.exp %325 : vector<8x128xf32>
    %cst_79 = arith.constant 1.000000e+00 : f32
    %327 = vector.broadcast %cst_79 : f32 to vector<8x128xf32>
    %328 = arith.addf %327, %326 : vector<8x128xf32>
    %329 = arith.divf %327, %328 : vector<8x128xf32>
    %330 = math.tanh %324 : vector<8x128xf32>
    %331 = vector.extract_strided_slice %329 {offsets = [0, 32], sizes = [8, 32], strides = [1, 1]} : vector<8x128xf32> to vector<8x32xf32>
    %332 = arith.mulf %331, %290 : vector<8x32xf32>
    %333 = vector.extract_strided_slice %329 {offsets = [0, 0], sizes = [8, 32], strides = [1, 1]} : vector<8x128xf32> to vector<8x32xf32>
    %334 = vector.extract_strided_slice %330 {offsets = [0, 64], sizes = [8, 32], strides = [1, 1]} : vector<8x128xf32> to vector<8x32xf32>
    %335 = arith.mulf %333, %334 : vector<8x32xf32>
    %336 = arith.addf %332, %335 : vector<8x32xf32>
    %337 = vector.extract_strided_slice %329 {offsets = [0, 96], sizes = [8, 32], strides = [1, 1]} : vector<8x128xf32> to vector<8x32xf32>
    %338 = math.tanh %336 : vector<8x32xf32>
    %339 = arith.mulf %337, %338 : vector<8x32xf32>
    %c0_80 = arith.constant 0 : index
    %c0_81 = arith.constant 0 : index
    %340 = vector.load %arg5[%c0_80, %c0_81] : memref<8x64xf32, #tpu.memory_space<vmem>>, vector<8x32xf32>
    tpu.vector_store %arg5[%c0_80, %c0_81], %339 {strides = array<i32>} : memref<8x64xf32, #tpu.memory_space<vmem>>, vector<8x32xf32>,
    %341 = vector.extract_strided_slice %321 {offsets = [0, 128], sizes = [8, 128], strides = [1, 1]} : vector<8x256xf32> to vector<8x128xf32>
    %342 = arith.negf %341 : vector<8x128xf32>
    %343 = math.exp %342 : vector<8x128xf32>
    %cst_82 = arith.constant 1.000000e+00 : f32
    %344 = vector.broadcast %cst_82 : f32 to vector<8x128xf32>
    %345 = arith.addf %344, %343 : vector<8x128xf32>
    %346 = arith.divf %344, %345 : vector<8x128xf32>
    %347 = math.tanh %341 : vector<8x128xf32>
    %348 = vector.extract_strided_slice %346 {offsets = [0, 32], sizes = [8, 32], strides = [1, 1]} : vector<8x128xf32> to vector<8x32xf32>
    %349 = arith.mulf %348, %307 : vector<8x32xf32>
    %350 = vector.extract_strided_slice %346 {offsets = [0, 0], sizes = [8, 32], strides = [1, 1]} : vector<8x128xf32> to vector<8x32xf32>
    %351 = vector.extract_strided_slice %347 {offsets = [0, 64], sizes = [8, 32], strides = [1, 1]} : vector<8x128xf32> to vector<8x32xf32>
    %352 = arith.mulf %350, %351 : vector<8x32xf32>
    %353 = arith.addf %349, %352 : vector<8x32xf32>
    %354 = vector.extract_strided_slice %346 {offsets = [0, 96], sizes = [8, 32], strides = [1, 1]} : vector<8x128xf32> to vector<8x32xf32>
    %355 = math.tanh %353 : vector<8x32xf32>
    %356 = arith.mulf %354, %355 : vector<8x32xf32>
    %c0_83 = arith.constant 0 : index
    %c32_84 = arith.constant 32 : index
    %357 = vector.load %arg5[%c0_83, %c32_84] : memref<8x64xf32, #tpu.memory_space<vmem>>, vector<8x32xf32>
    tpu.vector_store %arg5[%c0_83, %c32_84], %356 {strides = array<i32>} : memref<8x64xf32, #tpu.memory_space<vmem>>, vector<8x32xf32>,
    %c7_i32 = arith.constant 7 : i32
    %358 = vector.broadcast %c7_i32 : i32 to vector<8x1xi32>
    %359 = arith.cmpi eq, %6, %358 : vector<8x1xi32>
    %360 = vector.shape_cast %359 : vector<8x1xi1> to vector<8x1xi1>
    %361 = vector.broadcast %360 : vector<8x1xi1> to vector<8x32xi1>
    %362 = arith.select %361, %356, %316 : vector<8x32xi1>, vector<8x32xf32>
    %c0_85 = arith.constant 0 : index
    %c0_86 = arith.constant 0 : index
    %363 = vector.load %arg5[%c0_85, %c0_86] : memref<8x64xf32, #tpu.memory_space<vmem>>, vector<8x64xf32>
    %364 = arith.truncf %363 : vector<8x64xf32> to vector<8x64xbf16>
    %cst_87 = arith.constant dense<0.000000e+00> : vector<8x256xf32>
    %365 = tpu.matmul %364, %1, %cst_87 {dimension_numbers = #tpu.dot_dimension_numbers<[1], [0], [0], [1], [0, 0, 1, 1], [], []>} : vector<8x64xbf16>, vector<64x256xbf16>, vector<8x256xf32> -> vector<8x256xf32>
    %366 = vector.broadcast %4 : vector<1x256xf32> to vector<8x256xf32>
    %367 = arith.addf %365, %366 : vector<8x256xf32>
    %368 = vector.extract_strided_slice %367 {offsets = [0, 128], sizes = [8, 128], strides = [1, 1]} : vector<8x256xf32> to vector<8x128xf32>
    %369 = arith.negf %368 : vector<8x128xf32>
    %370 = math.exp %369 : vector<8x128xf32>
    %cst_88 = arith.constant 1.000000e+00 : f32
    %371 = vector.broadcast %cst_88 : f32 to vector<8x128xf32>
    %372 = arith.addf %371, %370 : vector<8x128xf32>
    %373 = arith.divf %371, %372 : vector<8x128xf32>
    %374 = math.tanh %368 : vector<8x128xf32>
    %375 = vector.extract_strided_slice %373 {offsets = [0, 32], sizes = [8, 32], strides = [1, 1]} : vector<8x128xf32> to vector<8x32xf32>
    %376 = arith.mulf %375, %353 : vector<8x32xf32>
    %377 = vector.extract_strided_slice %373 {offsets = [0, 0], sizes = [8, 32], strides = [1, 1]} : vector<8x128xf32> to vector<8x32xf32>
    %378 = vector.extract_strided_slice %374 {offsets = [0, 64], sizes = [8, 32], strides = [1, 1]} : vector<8x128xf32> to vector<8x32xf32>
    %379 = arith.mulf %377, %378 : vector<8x32xf32>
    %380 = arith.addf %376, %379 : vector<8x32xf32>
    %381 = vector.extract_strided_slice %373 {offsets = [0, 96], sizes = [8, 32], strides = [1, 1]} : vector<8x128xf32> to vector<8x32xf32>
    %382 = math.tanh %380 : vector<8x32xf32>
    %383 = arith.mulf %381, %382 : vector<8x32xf32>
    %c0_89 = arith.constant 0 : index
    %c32_90 = arith.constant 32 : index
    %384 = vector.load %arg5[%c0_89, %c32_90] : memref<8x64xf32, #tpu.memory_space<vmem>>, vector<8x32xf32>
    tpu.vector_store %arg5[%c0_89, %c32_90], %383 {strides = array<i32>} : memref<8x64xf32, #tpu.memory_space<vmem>>, vector<8x32xf32>,
    %c8_i32 = arith.constant 8 : i32
    %385 = vector.broadcast %c8_i32 : i32 to vector<8x1xi32>
    %386 = arith.cmpi eq, %6, %385 : vector<8x1xi32>
    %387 = vector.shape_cast %386 : vector<8x1xi1> to vector<8x1xi1>
    %388 = vector.broadcast %387 : vector<8x1xi1> to vector<8x32xi1>
    %389 = arith.select %388, %383, %362 : vector<8x32xi1>, vector<8x32xf32>
    %390 = arith.truncf %389 : vector<8x32xf32> to vector<8x32xbf16>
    %cst_91 = arith.constant dense<0.000000e+00> : vector<8x128xf32>
    %391 = tpu.matmul %390, %2, %cst_91 {dimension_numbers = #tpu.dot_dimension_numbers<[1], [0], [0], [1], [0, 0, 1, 1], [], []>} : vector<8x32xbf16>, vector<32x128xbf16>, vector<8x128xf32> -> vector<8x128xf32>
    %392 = vector.broadcast %5 : vector<1x128xf32> to vector<8x128xf32>
    %393 = arith.addf %391, %392 : vector<8x128xf32>
    %c0_92 = arith.constant 0 : index
    %c0_93 = arith.constant 0 : index
    %394 = vector.load %arg4[%c0_92, %c0_93] : memref<8x128xf32, #tpu.memory_space<vmem>>, vector<8x128xf32>
    tpu.vector_store %arg4[%c0_92, %c0_93], %393 {strides = array<i32>} : memref<8x128xf32, #tpu.memory_space<vmem>>, vector<8x128xf32>,
    return
  }
}

</mosaic_0001>

<bundles_post_ra>
// kernel: tpu_custom_call.1
= control target key start
LH: loop header
LB: loop body
LE: loop exit
PB: predicated region body
PF: predicated region fallthrough
CT: control target
= control target key end

     0   :  { %9 = vsyncpa [#allocation4], 0  ;;  %s1863_s0 = inlined_call_operand.vmem [shape: s32[8,1], index: 0, kind: input, shape index: {}]   ;;  %s1864_s1 = inlined_call_operand.vmem [shape: f32[64,16], index: 1, kind: input, shape index: {}]   ;;  %s1865_s2 = inlined_call_operand.hbm [shape: bf16[112,256], index: 2, kind: input, shape index: {}]   ;;  %s1866_s3 = inlined_call_operand.vmem [shape: f32[8,256], index: 3, kind: input, shape index: {}]   ;;  %s1867_s4 = inlined_call_operand.hbm [shape: f32[8,128], index: 4, kind: output, shape index: {}]  }
   0x1   :  { %10 = vsyncpa [#allocation5], 0  ;;  %s1484_s15 = smov [#allocation3]  }
   0x2   :  { %s20_s16 = sshll.u32 %s1484_s15, 4  ;;  %s21_s16 = int_to_ptr.vmem [resolvable:$true] %s20_s16 }
   0x3   :  { %s1448_s17 = scalar_lea.vmem %s21_s16, 1792  ;;  %p1453_p1 = scmp.lt.s32.totalorder %s21_s16, %s21_s16 }
   0x4   :  { %p1449_p0 = scmp.ne.s32.totalorder %s21_s16, %s1448_s17  ;;  %p1454_p2 = scmp.lt.s32.totalorder %s1448_s17, %s1448_s17 }
   0x6   :  { %p1455_p3 = por %p1454_p2, %p1453_p1 }
   0x8   :  { %p1456_p4 = pnand %p1455_p3, %p1449_p0 }
   0xa   :  { %1459 = shalt.err (!%p1456_p4)
}
   0xb   :  { %s1485_s18 = smov 128   ;;  %s1486_s19 = smov 8  }
   0xc   :  { %26 = dma.hbm_to_vmem [thread:$0]  %s1865_s2, 1792, %s21_s16, [#allocation4], %s1485_s18, %s1485_s18, %s1486_s19  }
   0xd   :  { %1480 = dma.done.wait [#allocation4], 1792  }
   0xe   :  { %1481 = vsyncadd [#allocation4], 4294965504  ;;  %vm148_vm0 = vcmask 523264   ;;  %v1487_v0 = vmov 0   ;;  %v1488_v1 = vmov 0.0   ;;  %v52_v7 = vld [vmem:[%s1864_s1] sm:$0xff]  ;;  %v153_v19 = vlaneseq }
   0xf   :  { %238 = vmatprep.mubr.bf16.mxu1 %v1487_v0  ;;  %149 = vst.msk [vmem:[#allocation2] sm:$0xff] %vm148_vm0, %v1488_v1  ;;  %1295 = vset.pattern.permute.xlu0 %v1487_v0  ;;  %v1526_v2 = vld [vmem:[#allocation3 + $0x44] ss:$8 sps:$4 sm:$0xff]   ;;  %v1528_v3 = vld [vmem:[#allocation3 + $0x40] ss:$8 sps:$4 sm:$0xff]   ;;  %vm70_vm1 = vcmask 130048  }
  0x10   :  { %1296 = vset.pattern.permute.xlu1 %v1487_v0  ;;  %214 = vmatprep.subr.bf16.mxu1 %v1526_v2  ;;  %v1300_v4 = vld [vmem:[#allocation3] ss:$8 sps:$4 sm:$0xff]   ;;  %v1532_v5 = vld [vmem:[#allocation3 + $0x34] ss:$8 sps:$4 sm:$0xff]   ;;  %v1534_v6 = vld [vmem:[#allocation3 + $0x30] ss:$8 sps:$4 sm:$0xff]  }
  0x11   :  { %215 = vmatpush1.bf16.msra.mxu1 %v1528_v3  ;;  %1268 = vmatprep.subr.bf16.mxu0 %v1300_v4  ;;  %v53_v8 = vld [vmem:[%s1864_s1 + $0x8] sm:$0xff]  ;;  %v54_v9 = vld [vmem:[%s1864_s1 + $0x10] sm:$0xff]  ;;  %v55_v10 = vld [vmem:[%s1864_s1 + $0x18] sm:$0xff]  ;;  %v1584_v20 = vshrl.u32 %v153_v19, 7  ;;  %s1489_s7 = smov 64   ;;  %s1490_s8 = smov 32  }
  0x12   :  { %216 = vmatprep.subr.bf16.mxu1 %v1532_v5  ;;  %1269 = vmatpush3.bf16.msra.mxu0 %v1300_v4  ;;  %v60_v11 = vpack.c.bf16 %v53_v8, %v52_v7  ;;  %v61_v12 = vpack.c.bf16 %v55_v10, %v54_v9  ;;  %v1549_v13 = vld [vmem:[#allocation3 + $0x24] ss:$8 sps:$4 sm:$0xff]   ;;  %v1554_v14 = vld [vmem:[#allocation3 + $0x20] ss:$8 sps:$4 sm:$0xff]   ;;  %v1556_v15 = vld [vmem:[#allocation3 + $0x14] ss:$8 sps:$4 sm:$0xff]  }
  0x13   :  { %290 = vmatprep.subr.bf16.mxu0 %v1526_v2  ;;  %v1563_v16 = vld [vmem:[#allocation3 + $0x10] ss:$8 sps:$4 sm:$0xff]   ;;  %v155_v21 = vsub.s32 0, %v1584_v20  ;;  %v57_v45 = vld [vmem:[%s1864_s1 + $0x28] sm:$0xff]  ;;  %v58_v46 = vld [vmem:[%s1864_s1 + $0x30] sm:$0xff]  ;;  %vm275_vm2 = vcmask 261120  }
  0x14   :  { %1270 = vmatprep.mubr.msk.bf16.mxu0 %vm70_vm1, %v60_v11  ;;  %v1590_v22 = vld [vmem:[%s1866_s3 + $0x1] ss:$8 sm:$0x3]  ;;  %v1600_v25 = vld [vmem:[%s1866_s3] ss:$0 sm:$0xff]  ;;  %v59_v48 = vld [vmem:[%s1864_s1 + $0x38] sm:$0xff] }
  0x15   :  { %217 = vmatpush1.bf16.msra.mxu1 %v1534_v6  ;;  %1271 = vmatmul.mubr.msk.bf16.vlgmr.msra.gmra.mxu0 %vm70_vm1, %v61_v12  ;;  %v1595_v24 = vrot.slane %v1590_v22, %v155_v21  ;;  %v56_v44 = vld [vmem:[%s1864_s1 + $0x20] sm:$0xff]  ;;  %v63_v49 = vpack.c.bf16 %v59_v48, %v58_v46  ;;  %v159_v61 = vsub.s32 1, %v1584_v20  ;;  %vm381_vm3 = vcmask 523520   ;;  %s1492_s19 = smov [#allocation6]  }
  0x16   :  { %218 = vmatprep.subr.bf16.mxu1 %v1549_v13  ;;  %291 = vmatpush1.bf16.msra.mxu0 %v1528_v3  ;;  %v150_v17 = vld [vmem:[#allocation2] sm:$0xff]  ;;  %v62_v47 = vpack.c.bf16 %v57_v45, %v56_v44  ;;  %vm1491_vm15 = vmmov 0   ;;  %s1209_s20 = sshll.u32 %s1492_s19, 4  ;;  %s1210_s20 = int_to_ptr.vmem [resolvable:$true] %s1209_s20 }
  0x17   :  { %292 = vmatprep.subr.bf16.mxu0 %v1532_v5  ;;  %v151_v18 = vpack.c.bf16 %v150_v17, %v150_v17  ;;  %v1649_v63 = vrot.slane %v1590_v22, %v159_v61  ;;  %s1460_s21 = scalar_lea.vmem %s1210_s20, 128  ;;  %p1465_p6 = scmp.lt.s32.totalorder %s1210_s20, %s1210_s20 }
  0x18   :  { %1274 = vmatprep.mubr.msk.bf16.mxu0 %vm70_vm1, %v62_v47  ;;  %p1461_p5 = scmp.ne.s32.totalorder %s1210_s20, %s1460_s21  ;;  %p1466_p7 = scmp.lt.s32.totalorder %s1460_s21, %s1460_s21 }
  0x19   :  { %219 = vmatpush1.bf16.msra.mxu1 %v1554_v14 }
  0x1a   :  { %220 = vmatprep.subr.bf16.mxu1 %v1556_v15  ;;  %293 = vmatpush1.bf16.msra.mxu0 %v1534_v6  ;;  %p1467_p8 = por %p1466_p7, %p1465_p6 }
  0x1b   :  { %294 = vmatprep.subr.bf16.mxu0 %v1549_v13 }
  0x1c   :  { %p1468_p9 = pnand %p1467_p8, %p1461_p5 }
  0x1d   :  { %221 = vmatpush1.bf16.msra.mxu1 %v1563_v16  ;;  %1275 = vmatmul.mubr.msk.bf16.gmra.mxu0 %vm70_vm1, %v63_v49 }
  0x1e   :  { %403 = vmatprep.subr.bf16.mxu1 %v1526_v2  ;;  %295 = vmatpush1.bf16.msra.mxu0 %v1554_v14 }
  0x1f   :  { %296 = vmatprep.subr.bf16.mxu0 %v1556_v15  ;;  %314 = vmatprep.mubr.bf16.mxu0 %v1487_v0 }
  0x20   :  { %1232 = vmatmul.mubr.msk.bf16.vlgmr.msra.gmra.mxu1 %vm148_vm0, %v151_v18 }
  0x21   :  { %404 = vmatpush1.bf16.msra.mxu1 %v1528_v3  ;;  %427 = vmatprep.mubr.bf16.mxu1 %v1487_v0 }
  0x22   :  { %405 = vmatprep.subr.bf16.mxu1 %v1532_v5  ;;  %297 = vmatpush1.bf16.msra.mxu0 %v1563_v16 }
  0x23   :  { %515 = vmatprep.subr.bf16.mxu0 %v1526_v2 }
  0x25   :  { %406 = vmatpush1.bf16.msra.mxu1 %v1534_v6 }
  0x26   :  { %407 = vmatprep.subr.bf16.mxu1 %v1549_v13 }
  0x29   :  { %408 = vmatpush1.bf16.msra.mxu1 %v1554_v14 }
  0x2a   :  { %409 = vmatprep.subr.bf16.mxu1 %v1556_v15 }
  0x2d   :  { %410 = vmatpush1.bf16.msra.mxu1 %v1563_v16 }
  0x2e   :  { %627 = vmatprep.subr.bf16.mxu1 %v1526_v2 }
  0xd5   :  { %v1592_v23 = vpop.f32.mrf.mxu0 }
  0xd7   :  { %v117_v26 = vpop.f32.mrf.mxu0 }
  0xd8   :  { %v118_v28 = vadd.f32 %v117_v26, %v1600_v25 }
  0xd9   :  { %v1637_v56 = vpop.f32.mrf.mxu0 }
  0xdb   :  { %v120_v57 = vpop.f32.mrf.mxu0 }
  0xdc   :  { %v121_v7 = vadd.f32 %v120_v57, %v1600_v25 }
  0xdd   :  { %v1639_v58 = vpop.f32.mrf.mxu0 }
  0xdf   :  { %v1641_v59 = vpop.f32.mrf.mxu0 }
  0xe0   :  { %v240_v27 = vpop.f32.mrf.mxu1 }
  0xe1   :  { %v241_v29 = vadd.f32 %v240_v27, %v1595_v24  ;;  %v1643_v60 = vpop.f32.mrf.mxu0 }
  0xe2   :  { %v242_v30 = vpop.f32.mrf.mxu1 }
  0xe3   :  { %v246_v31 = vadd.f32 %v241_v29, %v118_v28  ;;  %v1646_v62 = vpop.f32.mrf.mxu0 }
  0xe4   :  { %v243_v32 = vpop.f32.mrf.mxu1 }
  0xe5   :  { %1312 = vtanh.f32 %v246_v31  ;;  %v1233_v35 = vmul.f32 -1.442695, %v246_v31 }
  0xe6   :  { %v244_v33 = vpop.f32.mrf.mxu1 }
  0xe7   :  { %1314 = vpow2.f32 %v1233_v35 }
  0xf2   :  { %v1313_v34 = vpop.eup %1312 }
  0xf3   :  { %256 = vrot.lane.b32.xlu0 %v1313_v34, %s1489_s7 }
  0xf4   :  { %v1315_v36 = vpop.eup %1314 }
  0xf5   :  { %v250_v37 = vadd.f32 1.0, %v1315_v36 }
  0xf7   :  { %1316 = vrcp.f32 %v250_v37 }
 0x104   :  { %v1317_v38 = vpop.eup %1316 }
 0x105   :  { %v254_v41 = vmul.f32 0.0, %v1317_v38 }
 0x165   :  { %v257_v39 = vpop.permute.xlu0 %256 }
 0x166   :  { %v259_v40 = vmul.f32 %v1317_v38, %v257_v39 }
 0x168   :  { %261 = vrot.lane.b32.xlu0 %v259_v40, %s1490_s8 }
 0x1da   :  { %v262_v42 = vpop.permute.xlu0 %261 }
 0x1db   :  { %v1606_v43 = vadd.f32 %v262_v42, %v254_v41 }
 0x1dd   :  { %1318 = vtanh.f32 %v1606_v43 }
 0x1ea   :  { %v1319_v50 = vpop.eup %1318 }
 0x1eb   :  { %267 = vrot.lane.b32.xlu1 %v1319_v50, %s1489_s7 }
 0x25d   :  { %v268_v51 = vpop.permute.xlu1 %267 }
 0x25e   :  { %v270_v52 = vmul.f32 %v1317_v38, %v268_v51 }
 0x260   :  { %272 = vrot.lane.b32.xlu1 %v270_v52, %s1490_s8  ;;  %v126_v52 = vadd.f32 %v1592_v23, %v1600_v25 }
 0x2d2   :  { %v273_v53 = vpop.permute.xlu1 %272 }
 0x2d3   :  { %276 = vst.msk [vmem:[#allocation2] sm:$0xff] %vm275_vm2, %v273_v53 }
 0x2da   :  { %v277_v54 = vld [vmem:[#allocation2] sm:$0xff] }
 0x2db   :  { %v278_v55 = vpack.c.bf16 %v277_v54, %v277_v54 }
 0x2dd   :  { %1234 = vmatmul.mubr.msk.bf16.vlgmr.msra.gmra.mxu0 %vm148_vm0, %v278_v55 }
 0x2de   :  { %516 = vmatpush1.bf16.msra.mxu0 %v1528_v3  ;;  %539 = vmatprep.mubr.bf16.mxu0 %v1487_v0 }
 0x2df   :  { %517 = vmatprep.subr.bf16.mxu0 %v1532_v5 }
 0x2e2   :  { %518 = vmatpush1.bf16.msra.mxu0 %v1534_v6 }
 0x2e3   :  { %519 = vmatprep.subr.bf16.mxu0 %v1549_v13 }
 0x2e6   :  { %520 = vmatpush1.bf16.msra.mxu0 %v1554_v14 }
 0x2e7   :  { %521 = vmatprep.subr.bf16.mxu0 %v1556_v15 }
 0x2ea   :  { %522 = vmatpush1.bf16.msra.mxu0 %v1563_v16 }
 0x2eb   :  { %739 = vmatprep.subr.bf16.mxu0 %v1526_v2 }
 0x39d   :  { %v316_v4 = vpop.f32.mrf.mxu0 }
 0x39e   :  { %v317_v8 = vadd.f32 %v316_v4, %v1595_v24 }
 0x39f   :  { %v318_v9 = vpop.f32.mrf.mxu0 }
 0x3a0   :  { %v323_v10 = vadd.f32 %v317_v8, %v121_v7  ;;  %v319_v11 = vadd.f32 %v318_v9, %v1649_v63 }
 0x3a1   :  { %v320_v12 = vpop.f32.mrf.mxu0 }
 0x3a2   :  { %1320 = vtanh.f32 %v323_v10  ;;  %v1235_v20 = vmul.f32 -1.442695, %v323_v10  ;;  %v1236_v21 = vmul.f32 -1.442695, %v319_v11 }
 0x3a3   :  { %1322 = vtanh.f32 %v319_v11  ;;  %v321_v17 = vpop.f32.mrf.mxu0 }
 0x3a4   :  { %1324 = vpow2.f32 %v1235_v20 }
 0x3a5   :  { %1326 = vpow2.f32 %v1236_v21 }
 0x3af   :  { %v1321_v18 = vpop.eup %1320 }
 0x3b0   :  { %v1323_v19 = vpop.eup %1322  ;;  %333 = vrot.lane.b32.xlu0 %v1321_v18, %s1489_s7 }
 0x3b1   :  { %362 = vrot.lane.b32.xlu1 %v1323_v19, %s1489_s7  ;;  %v1325_v22 = vpop.eup %1324 }
 0x3b2   :  { %v1327_v26 = vpop.eup %1326  ;;  %v327_v27 = vadd.f32 1.0, %v1325_v22 }
 0x3b3   :  { %v356_v28 = vadd.f32 1.0, %v1327_v26 }
 0x3b4   :  { %1328 = vrcp.f32 %v327_v27 }
 0x3b5   :  { %1330 = vrcp.f32 %v356_v28 }
 0x3c1   :  { %v1329_v29 = vpop.eup %1328 }
 0x3c2   :  { %v1331_v31 = vpop.eup %1330  ;;  %v331_v35 = vmul.f32 %v1329_v29, %v1606_v43 }
 0x3c3   :  { %v360_v36 = vmul.f32 0.0, %v1331_v31 }
 0x422   :  { %v334_v30 = vpop.permute.xlu0 %333 }
 0x423   :  { %v363_v32 = vpop.permute.xlu1 %362  ;;  %v336_v33 = vmul.f32 %v1329_v29, %v334_v30 }
 0x424   :  { %v365_v34 = vmul.f32 %v1331_v31, %v363_v32 }
 0x425   :  { %338 = vrot.lane.b32.xlu0 %v336_v33, %s1490_s8 }
 0x426   :  { %367 = vrot.lane.b32.xlu1 %v365_v34, %s1490_s8 }
 0x497   :  { %v339_v37 = vpop.permute.xlu0 %338 }
 0x498   :  { %v368_v38 = vpop.permute.xlu1 %367  ;;  %v1659_v39 = vadd.f32 %v339_v37, %v331_v35 }
 0x499   :  { %v1661_v40 = vadd.f32 %v368_v38, %v360_v36 }
 0x49a   :  { %1332 = vtanh.f32 %v1659_v39 }
 0x49b   :  { %1334 = vtanh.f32 %v1661_v40 }
 0x4a7   :  { %v1333_v41 = vpop.eup %1332 }
 0x4a8   :  { %v1335_v42 = vpop.eup %1334  ;;  %344 = vrot.lane.b32.xlu0 %v1333_v41, %s1489_s7 }
 0x4a9   :  { %373 = vrot.lane.b32.xlu1 %v1335_v42, %s1489_s7 }
 0x51a   :  { %v345_v44 = vpop.permute.xlu0 %344 }
 0x51b   :  { %v374_v45 = vpop.permute.xlu1 %373  ;;  %v347_v43 = vmul.f32 %v1329_v29, %v345_v44 }
 0x51c   :  { %v1667_v46 = vmul.f32 %v1331_v31, %v374_v45  ;;  %v129_v45 = vadd.f32 %v1637_v56, %v1600_v25 }
 0x51d   :  { %349 = vrot.lane.b32.xlu0 %v347_v43, %s1490_s8 }
 0x51e   :  { %378 = vrot.lane.b32.xlu1 %v1667_v46, %s1489_s7 }
 0x58f   :  { %v350_v47 = vpop.permute.xlu0 %349 }
 0x590   :  { %v379_v48 = vpop.permute.xlu1 %378  ;;  %352 = vst.msk [vmem:[#allocation2] sm:$0xff] %vm275_vm2, %v350_v47 }
 0x591   :  { %382 = vst.msk [vmem:[#allocation2] sm:$0xff] %vm381_vm3, %v379_v48 }
 0x598   :  { %v390_v49 = vld [vmem:[#allocation2] sm:$0xff] }
 0x599   :  { %v391_v50 = vpack.c.bf16 %v390_v49, %v390_v49 }
 0x59b   :  { %1237 = vmatmul.mubr.msk.bf16.vlgmr.msra.gmra.mxu1 %vm148_vm0, %v391_v50 }
 0x59c   :  { %628 = vmatpush1.bf16.msra.mxu1 %v1528_v3  ;;  %651 = vmatprep.mubr.bf16.mxu1 %v1487_v0 }
 0x59d   :  { %629 = vmatprep.subr.bf16.mxu1 %v1532_v5 }
 0x5a0   :  { %630 = vmatpush1.bf16.msra.mxu1 %v1534_v6 }
 0x5a1   :  { %631 = vmatprep.subr.bf16.mxu1 %v1549_v13 }
 0x5a4   :  { %632 = vmatpush1.bf16.msra.mxu1 %v1554_v14 }
 0x5a5   :  { %633 = vmatprep.subr.bf16.mxu1 %v1556_v15 }
 0x5a8   :  { %634 = vmatpush1.bf16.msra.mxu1 %v1563_v16 }
 0x5a9   :  { %851 = vmatprep.subr.bf16.mxu1 %v1526_v2 }
 0x65b   :  { %v429_v51 = vpop.f32.mrf.mxu1 }
 0x65c   :  { %v430_v53 = vadd.f32 %v429_v51, %v1595_v24 }
 0x65d   :  { %v431_v54 = vpop.f32.mrf.mxu1 }
 0x65e   :  { %v436_v55 = vadd.f32 %v430_v53, %v126_v52  ;;  %v432_v57 = vadd.f32 %v431_v54, %v1649_v63 }
 0x65f   :  { %v433_v61 = vpop.f32.mrf.mxu1 }
 0x660   :  { %1336 = vtanh.f32 %v436_v55  ;;  %v1238_v9 = vmul.f32 -1.442695, %v436_v55  ;;  %v1239_v10 = vmul.f32 -1.442695, %v432_v57 }
 0x661   :  { %1338 = vtanh.f32 %v432_v57  ;;  %v434_v4 = vpop.f32.mrf.mxu1 }
 0x662   :  { %1340 = vpow2.f32 %v1238_v9 }
 0x663   :  { %1342 = vpow2.f32 %v1239_v10 }
 0x66d   :  { %v1337_v7 = vpop.eup %1336 }
 0x66e   :  { %v1339_v8 = vpop.eup %1338  ;;  %446 = vrot.lane.b32.xlu0 %v1337_v7, %s1489_s7 }
 0x66f   :  { %475 = vrot.lane.b32.xlu1 %v1339_v8, %s1489_s7  ;;  %v1341_v23 = vpop.eup %1340 }
 0x670   :  { %v1343_v11 = vpop.eup %1342  ;;  %v440_v12 = vadd.f32 1.0, %v1341_v23 }
 0x671   :  { %v469_v17 = vadd.f32 1.0, %v1343_v11 }
 0x672   :  { %1344 = vrcp.f32 %v440_v12 }
 0x673   :  { %1346 = vrcp.f32 %v469_v17 }
 0x67f   :  { %v1345_v18 = vpop.eup %1344 }
 0x680   :  { %v1347_v20 = vpop.eup %1346  ;;  %v444_v27 = vmul.f32 %v1345_v18, %v1659_v39 }
 0x681   :  { %v473_v28 = vmul.f32 %v1347_v20, %v1661_v40 }
 0x6e0   :  { %v447_v19 = vpop.permute.xlu0 %446 }
 0x6e1   :  { %v476_v21 = vpop.permute.xlu1 %475  ;;  %v449_v22 = vmul.f32 %v1345_v18, %v447_v19 }
 0x6e2   :  { %v478_v26 = vmul.f32 %v1347_v20, %v476_v21 }
 0x6e3   :  { %451 = vrot.lane.b32.xlu0 %v449_v22, %s1490_s8 }
 0x6e4   :  { %480 = vrot.lane.b32.xlu1 %v478_v26, %s1490_s8 }
 0x755   :  { %v452_v29 = vpop.permute.xlu0 %451 }
 0x756   :  { %v481_v30 = vpop.permute.xlu1 %480  ;;  %v454_v31 = vadd.f32 %v452_v29, %v444_v27 }
 0x757   :  { %v483_v32 = vadd.f32 %v481_v30, %v473_v28 }
 0x758   :  { %1348 = vtanh.f32 %v454_v31 }
 0x759   :  { %1350 = vtanh.f32 %v483_v32 }
 0x765   :  { %v1349_v33 = vpop.eup %1348 }
 0x766   :  { %v1351_v34 = vpop.eup %1350  ;;  %457 = vrot.lane.b32.xlu0 %v1349_v33, %s1489_s7 }
 0x767   :  { %486 = vrot.lane.b32.xlu1 %v1351_v34, %s1489_s7 }
 0x7d8   :  { %v458_v35 = vpop.permute.xlu0 %457 }
 0x7d9   :  { %v487_v36 = vpop.permute.xlu1 %486  ;;  %v460_v37 = vmul.f32 %v1345_v18, %v458_v35 }
 0x7da   :  { %v1696_v38 = vmul.f32 %v1347_v20, %v487_v36  ;;  %v134_v36 = vadd.f32 %v1641_v59, %v1600_v25 }
 0x7db   :  { %462 = vrot.lane.b32.xlu0 %v460_v37, %s1490_s8 }
 0x7dc   :  { %491 = vrot.lane.b32.xlu1 %v1696_v38, %s1489_s7 }
 0x84d   :  { %v463_v39 = vpop.permute.xlu0 %462 }
 0x84e   :  { %v492_v40 = vpop.permute.xlu1 %491  ;;  %465 = vst.msk [vmem:[#allocation2] sm:$0xff] %vm275_vm2, %v463_v39 }
 0x84f   :  { %494 = vst.msk [vmem:[#allocation2] sm:$0xff] %vm381_vm3, %v492_v40 }
 0x856   :  { %v502_v41 = vld [vmem:[#allocation2] sm:$0xff] }
 0x857   :  { %v503_v42 = vpack.c.bf16 %v502_v41, %v502_v41 }
 0x859   :  { %1240 = vmatmul.mubr.msk.bf16.vlgmr.msra.gmra.mxu0 %vm148_vm0, %v503_v42 }
 0x85a   :  { %740 = vmatpush1.bf16.msra.mxu0 %v1528_v3  ;;  %763 = vmatprep.mubr.bf16.mxu0 %v1487_v0 }
 0x85b   :  { %741 = vmatprep.subr.bf16.mxu0 %v1532_v5 }
 0x85e   :  { %742 = vmatpush1.bf16.msra.mxu0 %v1534_v6 }
 0x85f   :  { %743 = vmatprep.subr.bf16.mxu0 %v1549_v13 }
 0x862   :  { %744 = vmatpush1.bf16.msra.mxu0 %v1554_v14 }
 0x863   :  { %745 = vmatprep.subr.bf16.mxu0 %v1556_v15 }
 0x866   :  { %746 = vmatpush1.bf16.msra.mxu0 %v1563_v16 }
 0x867   :  { %963 = vmatprep.subr.bf16.mxu0 %v1526_v2 }
 0x919   :  { %v541_v44 = vpop.f32.mrf.mxu0 }
 0x91a   :  { %v542_v43 = vadd.f32 %v541_v44, %v1595_v24 }
 0x91b   :  { %v543_v47 = vpop.f32.mrf.mxu0 }
 0x91c   :  { %v548_v48 = vadd.f32 %v542_v43, %v129_v45  ;;  %v544_v49 = vadd.f32 %v543_v47, %v1649_v63 }
 0x91d   :  { %v545_v50 = vpop.f32.mrf.mxu0 }
 0x91e   :  { %1352 = vtanh.f32 %v548_v48  ;;  %v1241_v54 = vmul.f32 -1.442695, %v548_v48  ;;  %v1242_v55 = vmul.f32 -1.442695, %v544_v49 }
 0x91f   :  { %1354 = vtanh.f32 %v544_v49  ;;  %v546_v51 = vpop.f32.mrf.mxu0 }
 0x920   :  { %1356 = vpow2.f32 %v1241_v54 }
 0x921   :  { %1358 = vpow2.f32 %v1242_v55 }
 0x92b   :  { %v1353_v52 = vpop.eup %1352 }
 0x92c   :  { %v1355_v53 = vpop.eup %1354  ;;  %558 = vrot.lane.b32.xlu0 %v1353_v52, %s1489_s7 }
 0x92d   :  { %587 = vrot.lane.b32.xlu1 %v1355_v53, %s1489_s7  ;;  %v1357_v56 = vpop.eup %1356 }
 0x92e   :  { %v1359_v57 = vpop.eup %1358  ;;  %v552_v61 = vadd.f32 1.0, %v1357_v56 }
 0x92f   :  { %v581_v4 = vadd.f32 1.0, %v1359_v57 }
 0x930   :  { %1360 = vrcp.f32 %v552_v61 }
 0x931   :  { %1362 = vrcp.f32 %v581_v4 }
 0x93d   :  { %v1361_v7 = vpop.eup %1360 }
 0x93e   :  { %v1363_v9 = vpop.eup %1362  ;;  %v556_v12 = vmul.f32 %v1361_v7, %v454_v31 }
 0x93f   :  { %v585_v17 = vmul.f32 %v1363_v9, %v483_v32 }
 0x99e   :  { %v559_v8 = vpop.permute.xlu0 %558 }
 0x99f   :  { %v588_v10 = vpop.permute.xlu1 %587  ;;  %v561_v23 = vmul.f32 %v1361_v7, %v559_v8 }
 0x9a0   :  { %v590_v11 = vmul.f32 %v1363_v9, %v588_v10 }
 0x9a1   :  { %563 = vrot.lane.b32.xlu0 %v561_v23, %s1490_s8 }
 0x9a2   :  { %592 = vrot.lane.b32.xlu1 %v590_v11, %s1490_s8 }
 0xa13   :  { %v564_v18 = vpop.permute.xlu0 %563 }
 0xa14   :  { %v593_v19 = vpop.permute.xlu1 %592  ;;  %v566_v20 = vadd.f32 %v564_v18, %v556_v12 }
 0xa15   :  { %v595_v21 = vadd.f32 %v593_v19, %v585_v17 }
 0xa16   :  { %1364 = vtanh.f32 %v566_v20 }
 0xa17   :  { %1366 = vtanh.f32 %v595_v21 }
 0xa23   :  { %v1365_v22 = vpop.eup %1364 }
 0xa24   :  { %v1367_v26 = vpop.eup %1366  ;;  %569 = vrot.lane.b32.xlu0 %v1365_v22, %s1489_s7 }
 0xa25   :  { %598 = vrot.lane.b32.xlu1 %v1367_v26, %s1489_s7 }
 0xa96   :  { %v570_v27 = vpop.permute.xlu0 %569 }
 0xa97   :  { %v599_v28 = vpop.permute.xlu1 %598  ;;  %v572_v29 = vmul.f32 %v1361_v7, %v570_v27  ;;  %v137_v27 = vadd.f32 %v1646_v62, %v1600_v25 }
 0xa98   :  { %v1723_v30 = vmul.f32 %v1363_v9, %v599_v28 }
 0xa99   :  { %574 = vrot.lane.b32.xlu0 %v572_v29, %s1490_s8 }
 0xa9a   :  { %603 = vrot.lane.b32.xlu1 %v1723_v30, %s1489_s7 }
 0xb0b   :  { %v575_v31 = vpop.permute.xlu0 %574 }
 0xb0c   :  { %v604_v32 = vpop.permute.xlu1 %603  ;;  %577 = vst.msk [vmem:[#allocation2] sm:$0xff] %vm275_vm2, %v575_v31 }
 0xb0d   :  { %606 = vst.msk [vmem:[#allocation2] sm:$0xff] %vm381_vm3, %v604_v32 }
 0xb14   :  { %v614_v33 = vld [vmem:[#allocation2] sm:$0xff] }
 0xb15   :  { %v615_v34 = vpack.c.bf16 %v614_v33, %v614_v33 }
 0xb17   :  { %1243 = vmatmul.mubr.msk.bf16.vlgmr.msra.gmra.mxu1 %vm148_vm0, %v615_v34 }
 0xb18   :  { %852 = vmatpush1.bf16.msra.mxu1 %v1528_v3  ;;  %875 = vmatprep.mubr.bf16.mxu1 %v1487_v0 }
 0xb19   :  { %853 = vmatprep.subr.bf16.mxu1 %v1532_v5 }
 0xb1c   :  { %854 = vmatpush1.bf16.msra.mxu1 %v1534_v6 }
 0xb1d   :  { %855 = vmatprep.subr.bf16.mxu1 %v1549_v13 }
 0xb20   :  { %856 = vmatpush1.bf16.msra.mxu1 %v1554_v14 }
 0xb21   :  { %857 = vmatprep.subr.bf16.mxu1 %v1556_v15 }
 0xb24   :  { %858 = vmatpush1.bf16.msra.mxu1 %v1563_v16 }
 0xb25   :  { %1075 = vmatprep.subr.bf16.mxu1 %v1526_v2 }
 0xbd7   :  { %v653_v35 = vpop.f32.mrf.mxu1 }
 0xbd8   :  { %v654_v37 = vadd.f32 %v653_v35, %v1595_v24 }
 0xbd9   :  { %v655_v39 = vpop.f32.mrf.mxu1 }
 0xbda   :  { %v660_v40 = vadd.f32 %v654_v37, %v134_v36  ;;  %v656_v41 = vadd.f32 %v655_v39, %v1649_v63 }
 0xbdb   :  { %v657_v42 = vpop.f32.mrf.mxu1 }
 0xbdc   :  { %1368 = vtanh.f32 %v660_v40  ;;  %v1244_v2 = vmul.f32 -1.442695, %v660_v40  ;;  %v1245_v47 = vmul.f32 -1.442695, %v656_v41 }
 0xbdd   :  { %1370 = vtanh.f32 %v656_v41  ;;  %v658_v44 = vpop.f32.mrf.mxu1 }
 0xbde   :  { %1372 = vpow2.f32 %v1244_v2 }
 0xbdf   :  { %1374 = vpow2.f32 %v1245_v47 }
 0xbe9   :  { %v1369_v45 = vpop.eup %1368 }
 0xbea   :  { %v1371_v43 = vpop.eup %1370  ;;  %670 = vrot.lane.b32.xlu0 %v1369_v45, %s1489_s7 }
 0xbeb   :  { %699 = vrot.lane.b32.xlu1 %v1371_v43, %s1489_s7  ;;  %v1373_v59 = vpop.eup %1372 }
 0xbec   :  { %v1375_v48 = vpop.eup %1374  ;;  %v664_v49 = vadd.f32 1.0, %v1373_v59 }
 0xbed   :  { %v693_v50 = vadd.f32 1.0, %v1375_v48 }
 0xbee   :  { %1376 = vrcp.f32 %v664_v49 }
 0xbef   :  { %1378 = vrcp.f32 %v693_v50 }
 0xbfb   :  { %v1377_v51 = vpop.eup %1376 }
 0xbfc   :  { %v1379_v53 = vpop.eup %1378  ;;  %v668_v57 = vmul.f32 %v1377_v51, %v566_v20 }
 0xbfd   :  { %v697_v61 = vmul.f32 %v1379_v53, %v595_v21 }
 0xc5c   :  { %v671_v52 = vpop.permute.xlu0 %670 }
 0xc5d   :  { %v700_v54 = vpop.permute.xlu1 %699  ;;  %v673_v55 = vmul.f32 %v1377_v51, %v671_v52 }
 0xc5e   :  { %v702_v56 = vmul.f32 %v1379_v53, %v700_v54 }
 0xc5f   :  { %675 = vrot.lane.b32.xlu0 %v673_v55, %s1490_s8 }
 0xc60   :  { %704 = vrot.lane.b32.xlu1 %v702_v56, %s1490_s8 }
 0xcd1   :  { %v676_v4 = vpop.permute.xlu0 %675 }
 0xcd2   :  { %v705_v7 = vpop.permute.xlu1 %704  ;;  %v678_v8 = vadd.f32 %v676_v4, %v668_v57 }
 0xcd3   :  { %v707_v9 = vadd.f32 %v705_v7, %v697_v61 }
 0xcd4   :  { %1380 = vtanh.f32 %v678_v8 }
 0xcd5   :  { %1382 = vtanh.f32 %v707_v9 }
 0xce1   :  { %v1381_v10 = vpop.eup %1380 }
 0xce2   :  { %v1383_v23 = vpop.eup %1382  ;;  %681 = vrot.lane.b32.xlu0 %v1381_v10, %s1489_s7 }
 0xce3   :  { %710 = vrot.lane.b32.xlu1 %v1383_v23, %s1489_s7 }
 0xd54   :  { %v682_v11 = vpop.permute.xlu0 %681 }
 0xd55   :  { %v711_v12 = vpop.permute.xlu1 %710  ;;  %v684_v17 = vmul.f32 %v1377_v51, %v682_v11  ;;  %v142_v11 = vadd.f32 %v1639_v58, %v1600_v25 }
 0xd56   :  { %v1750_v18 = vmul.f32 %v1379_v53, %v711_v12 }
 0xd57   :  { %686 = vrot.lane.b32.xlu0 %v684_v17, %s1490_s8 }
 0xd58   :  { %715 = vrot.lane.b32.xlu1 %v1750_v18, %s1489_s7 }
 0xdc9   :  { %v687_v19 = vpop.permute.xlu0 %686 }
 0xdca   :  { %v716_v20 = vpop.permute.xlu1 %715  ;;  %689 = vst.msk [vmem:[#allocation2] sm:$0xff] %vm275_vm2, %v687_v19 }
 0xdcb   :  { %718 = vst.msk [vmem:[#allocation2] sm:$0xff] %vm381_vm3, %v716_v20 }
 0xdd2   :  { %v726_v21 = vld [vmem:[#allocation2] sm:$0xff] }
 0xdd3   :  { %v727_v22 = vpack.c.bf16 %v726_v21, %v726_v21 }
 0xdd5   :  { %1246 = vmatmul.mubr.msk.bf16.vlgmr.msra.gmra.mxu0 %vm148_vm0, %v727_v22 }
 0xdd6   :  { %964 = vmatpush1.bf16.msra.mxu0 %v1528_v3  ;;  %987 = vmatprep.mubr.bf16.mxu0 %v1487_v0 }
 0xdd7   :  { %965 = vmatprep.subr.bf16.mxu0 %v1532_v5 }
 0xdda   :  { %966 = vmatpush1.bf16.msra.mxu0 %v1534_v6 }
 0xddb   :  { %967 = vmatprep.subr.bf16.mxu0 %v1549_v13 }
 0xdde   :  { %968 = vmatpush1.bf16.msra.mxu0 %v1554_v14 }
 0xddf   :  { %969 = vmatprep.subr.bf16.mxu0 %v1556_v15 }
 0xde2   :  { %970 = vmatpush1.bf16.msra.mxu0 %v1563_v16 }
 0xde3   :  { %1278 = vmatprep.subr.bf16.mxu0 %v1488_v1 }
 0xe95   :  { %v765_v26 = vpop.f32.mrf.mxu0 }
 0xe96   :  { %v766_v28 = vadd.f32 %v765_v26, %v1595_v24 }
 0xe97   :  { %v767_v29 = vpop.f32.mrf.mxu0 }
 0xe98   :  { %v772_v31 = vadd.f32 %v766_v28, %v137_v27  ;;  %v768_v32 = vadd.f32 %v767_v29, %v1649_v63 }
 0xe99   :  { %v769_v33 = vpop.f32.mrf.mxu0 }
 0xe9a   :  { %1384 = vtanh.f32 %v772_v31  ;;  %v1247_v37 = vmul.f32 -1.442695, %v772_v31  ;;  %v1248_v39 = vmul.f32 -1.442695, %v768_v32 }
 0xe9b   :  { %1386 = vtanh.f32 %v768_v32  ;;  %v770_v34 = vpop.f32.mrf.mxu0 }
 0xe9c   :  { %1388 = vpow2.f32 %v1247_v37 }
 0xe9d   :  { %1390 = vpow2.f32 %v1248_v39 }
 0xea7   :  { %v1385_v35 = vpop.eup %1384 }
 0xea8   :  { %v1387_v36 = vpop.eup %1386  ;;  %782 = vrot.lane.b32.xlu0 %v1385_v35, %s1489_s7 }
 0xea9   :  { %811 = vrot.lane.b32.xlu1 %v1387_v36, %s1489_s7  ;;  %v1389_v62 = vpop.eup %1388 }
 0xeaa   :  { %v1391_v40 = vpop.eup %1390  ;;  %v776_v41 = vadd.f32 1.0, %v1389_v62 }
 0xeab   :  { %v805_v42 = vadd.f32 1.0, %v1391_v40 }
 0xeac   :  { %1392 = vrcp.f32 %v776_v41 }
 0xead   :  { %1394 = vrcp.f32 %v805_v42 }
 0xeb9   :  { %v1393_v44 = vpop.eup %1392 }
 0xeba   :  { %v1395_v43 = vpop.eup %1394  ;;  %v780_v48 = vmul.f32 %v1393_v44, %v678_v8 }
 0xebb   :  { %v809_v49 = vmul.f32 %v1395_v43, %v707_v9 }
 0xf1a   :  { %v783_v45 = vpop.permute.xlu0 %782 }
 0xf1b   :  { %v812_v2 = vpop.permute.xlu1 %811  ;;  %v785_v47 = vmul.f32 %v1393_v44, %v783_v45 }
 0xf1c   :  { %v814_v59 = vmul.f32 %v1395_v43, %v812_v2 }
 0xf1d   :  { %787 = vrot.lane.b32.xlu0 %v785_v47, %s1490_s8 }
 0xf1e   :  { %816 = vrot.lane.b32.xlu1 %v814_v59, %s1490_s8 }
 0xf8f   :  { %v788_v50 = vpop.permute.xlu0 %787 }
 0xf90   :  { %v817_v51 = vpop.permute.xlu1 %816  ;;  %v790_v52 = vadd.f32 %v788_v50, %v780_v48 }
 0xf91   :  { %v819_v53 = vadd.f32 %v817_v51, %v809_v49  ;;  %v145_v49 = vadd.f32 %v1643_v60, %v1600_v25 }
 0xf92   :  { %1396 = vtanh.f32 %v790_v52 }
 0xf93   :  { %1398 = vtanh.f32 %v819_v53 }
 0xf9f   :  { %v1397_v54 = vpop.eup %1396 }
 0xfa0   :  { %v1399_v55 = vpop.eup %1398  ;;  %793 = vrot.lane.b32.xlu0 %v1397_v54, %s1489_s7 }
 0xfa1   :  { %822 = vrot.lane.b32.xlu1 %v1399_v55, %s1489_s7 }
0x1012   :  { %v794_v56 = vpop.permute.xlu0 %793 }
0x1013   :  { %v823_v57 = vpop.permute.xlu1 %822  ;;  %v796_v61 = vmul.f32 %v1393_v44, %v794_v56 }
0x1014   :  { %v1777_v4 = vmul.f32 %v1395_v43, %v823_v57 }
0x1015   :  { %798 = vrot.lane.b32.xlu0 %v796_v61, %s1490_s8 }
0x1016   :  { %827 = vrot.lane.b32.xlu1 %v1777_v4, %s1489_s7 }
0x1087   :  { %v799_v7 = vpop.permute.xlu0 %798 }
0x1088   :  { %v828_v8 = vpop.permute.xlu1 %827  ;;  %801 = vst.msk [vmem:[#allocation2] sm:$0xff] %vm275_vm2, %v799_v7 }
0x1089   :  { %830 = vst.msk [vmem:[#allocation2] sm:$0xff] %vm381_vm3, %v828_v8 }
0x1090   :  { %v838_v9 = vld [vmem:[#allocation2] sm:$0xff] }
0x1091   :  { %v839_v10 = vpack.c.bf16 %v838_v9, %v838_v9 }
0x1093   :  { %1249 = vmatmul.mubr.msk.bf16.vlgmr.msra.gmra.mxu1 %vm148_vm0, %v839_v10 }
0x1094   :  { %1076 = vmatpush1.bf16.msra.mxu1 %v1528_v3  ;;  %1099 = vmatprep.mubr.bf16.mxu1 %v1487_v0 }
0x1095   :  { %1077 = vmatprep.subr.bf16.mxu1 %v1532_v5 }
0x1098   :  { %1078 = vmatpush1.bf16.msra.mxu1 %v1534_v6 }
0x1099   :  { %1079 = vmatprep.subr.bf16.mxu1 %v1549_v13 }
0x109c   :  { %1080 = vmatpush1.bf16.msra.mxu1 %v1554_v14 }
0x109d   :  { %1081 = vmatprep.subr.bf16.mxu1 %v1556_v15 }
0x10a0   :  { %1082 = vmatpush1.bf16.msra.mxu1 %v1563_v16 }
0x1153   :  { %v877_v23 = vpop.f32.mrf.mxu1 }
0x1154   :  { %v878_v3 = vadd.f32 %v877_v23, %v1595_v24 }
0x1155   :  { %v879_v12 = vpop.f32.mrf.mxu1 }
0x1156   :  { %v884_v17 = vadd.f32 %v878_v3, %v142_v11  ;;  %v880_v5 = vadd.f32 %v879_v12, %v1649_v63 }
0x1157   :  { %v881_v19 = vpop.f32.mrf.mxu1 }
0x1158   :  { %1400 = vtanh.f32 %v884_v17  ;;  %v1250_v15 = vmul.f32 -1.442695, %v884_v17  ;;  %v1251_v16 = vmul.f32 -1.442695, %v880_v5 }
0x1159   :  { %1402 = vtanh.f32 %v880_v5  ;;  %v882_v6 = vpop.f32.mrf.mxu1 }
0x115a   :  { %1404 = vpow2.f32 %v1250_v15 }
0x115b   :  { %1406 = vpow2.f32 %v1251_v16 }
0x1165   :  { %v1401_v13 = vpop.eup %1400 }
0x1166   :  { %v1403_v14 = vpop.eup %1402  ;;  %894 = vrot.lane.b32.xlu0 %v1401_v13, %s1489_s7 }
0x1167   :  { %923 = vrot.lane.b32.xlu1 %v1403_v14, %s1489_s7  ;;  %v1405_v58 = vpop.eup %1404 }
0x1168   :  { %v1407_v20 = vpop.eup %1406  ;;  %v888_v21 = vadd.f32 1.0, %v1405_v58 }
0x1169   :  { %v917_v22 = vadd.f32 1.0, %v1407_v20 }
0x116a   :  { %1408 = vrcp.f32 %v888_v21 }
0x116b   :  { %1410 = vrcp.f32 %v917_v22 }
0x1177   :  { %v1409_v26 = vpop.eup %1408 }
0x1178   :  { %v1411_v28 = vpop.eup %1410  ;;  %v892_v33 = vmul.f32 %v1409_v26, %v790_v52 }
0x1179   :  { %v921_v34 = vmul.f32 %v1411_v28, %v819_v53 }
0x11d8   :  { %v895_v27 = vpop.permute.xlu0 %894 }
0x11d9   :  { %v924_v29 = vpop.permute.xlu1 %923  ;;  %v897_v31 = vmul.f32 %v1409_v26, %v895_v27 }
0x11da   :  { %v926_v32 = vmul.f32 %v1411_v28, %v924_v29 }
0x11db   :  { %899 = vrot.lane.b32.xlu0 %v897_v31, %s1490_s8 }
0x11dc   :  { %928 = vrot.lane.b32.xlu1 %v926_v32, %s1490_s8 }
0x124d   :  { %v900_v35 = vpop.permute.xlu0 %899 }
0x124e   :  { %v929_v36 = vpop.permute.xlu1 %928  ;;  %v902_v37 = vadd.f32 %v900_v35, %v892_v33 }
0x124f   :  { %v931_v39 = vadd.f32 %v929_v36, %v921_v34  ;;  %v51_v36 = vld [vmem:[%s1863_s0] sm:$0xff] }
0x1250   :  { %1412 = vtanh.f32 %v902_v37  ;;  %vm383_vm4 = vcmp.eq.s32.totalorder %v51_v36, 1  ;;  %vm719_vm5 = vcmp.eq.s32.totalorder %v51_v36, 4  ;;  %vm943_vm6 = vcmp.eq.s32.totalorder %v51_v36, 6 }
0x1251   :  { %1414 = vtanh.f32 %v931_v39  ;;  %vm1136_vm7 = vcmp.eq.s32.totalorder %v51_v36, 8  ;;  %vm495_vm8 = vcmp.eq.s32.totalorder %v51_v36, 2  ;;  %vm607_vm9 = vcmp.eq.s32.totalorder %v51_v36, 3 }
0x1252   :  { %vm831_vm10 = vcmp.eq.s32.totalorder %v51_v36, 5  ;;  %vm1055_vm11 = vcmp.eq.s32.totalorder %v51_v36, 7 }
0x125d   :  { %v1413_v62 = vpop.eup %1412 }
0x125e   :  { %v1415_v40 = vpop.eup %1414  ;;  %905 = vrot.lane.b32.xlu0 %v1413_v62, %s1489_s7  ;;  %v720_v62 = vsel %vm719_vm5, 1, %v1487_v0 }
0x125f   :  { %934 = vrot.lane.b32.xlu1 %v1415_v40, %s1489_s7  ;;  %v1137_v40 = vsel %vm1136_vm7, 1, %v1487_v0 }
0x12d0   :  { %v906_v41 = vpop.permute.xlu0 %905 }
0x12d1   :  { %v935_v42 = vpop.permute.xlu1 %934  ;;  %v908_v44 = vmul.f32 %v1409_v26, %v906_v41 }
0x12d2   :  { %v1803_v45 = vmul.f32 %v1411_v28, %v935_v42 }
0x12d3   :  { %910 = vrot.lane.b32.xlu0 %v908_v44, %s1490_s8 }
0x12d4   :  { %939 = vrot.lane.b32.xlu1 %v1803_v45, %s1489_s7 }
0x1345   :  { %v911_v43 = vpop.permute.xlu0 %910 }
0x1346   :  { %v940_v2 = vpop.permute.xlu1 %939  ;;  %913 = vst.msk [vmem:[#allocation2] sm:$0xff] %vm275_vm2, %v911_v43 }
0x1347   :  { %942 = vst.msk [vmem:[#allocation2] sm:$0xff] %vm381_vm3, %v940_v2 }
0x134e   :  { %v950_v47 = vld [vmem:[#allocation2] sm:$0xff] }
0x134f   :  { %v951_v59 = vpack.c.bf16 %v950_v47, %v950_v47 }
0x1351   :  { %1252 = vmatmul.mubr.msk.bf16.vlgmr.msra.gmra.mxu0 %vm148_vm0, %v951_v59  ;;  %v496_v59 = vsel %vm495_vm8, 1, %v1487_v0 }
0x1352   :  { %1282 = vmatprep.mubr.msk.bf16.mxu0 %vm1491_vm15, %v1488_v1 }
0x1411   :  { %v989_v48 = vpop.f32.mrf.mxu0 }
0x1412   :  { %v990_v50 = vadd.f32 %v989_v48, %v1595_v24  ;;  %v608_v48 = vsel %vm607_vm9, 1, %v1487_v0 }
0x1413   :  { %v991_v51 = vpop.f32.mrf.mxu0 }
0x1414   :  { %v996_v52 = vadd.f32 %v990_v50, %v145_v49  ;;  %v992_v53 = vadd.f32 %v991_v51, %v1649_v63  ;;  %v832_v49 = vsel %vm831_vm10, 1, %v1487_v0  ;;  %v1056_v50 = vsel %vm1055_vm11, 1, %v1487_v0 }
0x1415   :  { %v993_v54 = vpop.f32.mrf.mxu0 }
0x1416   :  { %1416 = vtanh.f32 %v996_v52  ;;  %v1253_v61 = vmul.f32 -1.442695, %v996_v52  ;;  %v1254_v7 = vmul.f32 -1.442695, %v992_v53  ;;  %v1310_v54 = vld [vmem:[#allocation3 + $0x60] ss:$8 sps:$4 sm:$0xff]  }
0x1417   :  { %1418 = vtanh.f32 %v992_v53  ;;  %v994_v55 = vpop.f32.mrf.mxu0  ;;  %1279 = vmatpush3.bf16.msra.mxu0 %v1310_v54 }
0x1418   :  { %1420 = vpow2.f32 %v1253_v61  ;;  %v1311_v55 = vld [vmem:[#allocation3 + $0x50] ss:$8 sps:$4 sm:$0xff]   ;;  %1280 = vmatprep.subr.bf16.mxu0 %v1488_v1 }
0x1419   :  { %1422 = vpow2.f32 %v1254_v7 }
0x141b   :  { %1281 = vmatpush3.bf16.msra.mxu0 %v1311_v55 }
0x1423   :  { %v1417_v56 = vpop.eup %1416 }
0x1424   :  { %v1419_v57 = vpop.eup %1418  ;;  %1006 = vrot.lane.b32.xlu0 %v1417_v56, %s1489_s7 }
0x1425   :  { %1035 = vrot.lane.b32.xlu1 %v1419_v57, %s1489_s7  ;;  %v1421_v25 = vpop.eup %1420 }
0x1426   :  { %v1423_v24 = vpop.eup %1422  ;;  %v1000_v60 = vadd.f32 1.0, %v1421_v25 }
0x1427   :  { %v1029_v8 = vadd.f32 1.0, %v1423_v24 }
0x1428   :  { %1424 = vrcp.f32 %v1000_v60 }
0x1429   :  { %1426 = vrcp.f32 %v1029_v8 }
0x1435   :  { %v1425_v9 = vpop.eup %1424 }
0x1436   :  { %v1427_v23 = vpop.eup %1426  ;;  %v1004_v17 = vmul.f32 %v1425_v9, %v902_v37 }
0x1437   :  { %v1033_v5 = vmul.f32 %v1427_v23, %v931_v39  ;;  %v384_v39 = vsel %vm383_vm4, 1, %v1487_v0 }
0x1496   :  { %v1007_v10 = vpop.permute.xlu0 %1006 }
0x1497   :  { %v1036_v11 = vpop.permute.xlu1 %1035  ;;  %v1009_v3 = vmul.f32 %v1425_v9, %v1007_v10 }
0x1498   :  { %v1038_v12 = vmul.f32 %v1427_v23, %v1036_v11 }
0x1499   :  { %1011 = vrot.lane.b32.xlu0 %v1009_v3, %s1490_s8 }
0x149a   :  { %1040 = vrot.lane.b32.xlu1 %v1038_v12, %s1490_s8 }
0x150b   :  { %v1012_v19 = vpop.permute.xlu0 %1011 }
0x150c   :  { %v1041_v6 = vpop.permute.xlu1 %1040  ;;  %v1014_v13 = vadd.f32 %v1012_v19, %v1004_v17 }
0x150d   :  { %v1043_v14 = vadd.f32 %v1041_v6, %v1033_v5 }
0x150e   :  { %1428 = vtanh.f32 %v1014_v13 }
0x150f   :  { %1430 = vtanh.f32 %v1043_v14 }
0x151b   :  { %v1429_v15 = vpop.eup %1428 }
0x151c   :  { %v1431_v16 = vpop.eup %1430  ;;  %1017 = vrot.lane.b32.xlu0 %v1429_v15, %s1489_s7 }
0x151d   :  { %1046 = vrot.lane.b32.xlu1 %v1431_v16, %s1489_s7 }
0x158e   :  { %v1018_v58 = vpop.permute.xlu0 %1017 }
0x158f   :  { %v1047_v20 = vpop.permute.xlu1 %1046  ;;  %v1020_v21 = vmul.f32 %v1425_v9, %v1018_v58 }
0x1590   :  { %v1821_v22 = vmul.f32 %v1427_v23, %v1047_v20 }
0x1591   :  { %1022 = vrot.lane.b32.xlu0 %v1020_v21, %s1490_s8 }
0x1592   :  { %1051 = vrot.lane.b32.xlu1 %v1821_v22, %s1489_s7 }
0x1603   :  { %v1023_v26 = vpop.permute.xlu0 %1022 }
0x1604   :  { %v1052_v27 = vpop.permute.xlu1 %1051  ;;  %1025 = vst.msk [vmem:[#allocation2] sm:$0xff] %vm275_vm2, %v1023_v26 }
0x1605   :  { %1054 = vst.msk [vmem:[#allocation2] sm:$0xff] %vm381_vm3, %v1052_v27 }
0x160c   :  { %v1062_v28 = vld [vmem:[#allocation2] sm:$0xff] }
0x160d   :  { %v1063_v29 = vpack.c.bf16 %v1062_v28, %v1062_v28 }
0x160f   :  { %1255 = vmatmul.mubr.msk.bf16.vlgmr.msra.gmra.mxu1 %vm148_vm0, %v1063_v29 }
0x16cf   :  { %v1101_v31 = vpop.f32.mrf.mxu1 }
0x16d1   :  { %v1102_v32 = vpop.f32.mrf.mxu1 }
0x16d2   :  { %v1103_v33 = vadd.f32 %v1102_v32, %v1649_v63  ;;  %v944_v63 = vsel %vm943_vm6, 1, %v1487_v0 }
0x16d3   :  { %v1104_v34 = vpop.f32.mrf.mxu1 }
0x16d4   :  { %1432 = vtanh.f32 %v1103_v33  ;;  %v1256_v41 = vmul.f32 -1.442695, %v1103_v33 }
0x16d5   :  { %v1105_v35 = vpop.f32.mrf.mxu1 }
0x16d6   :  { %1434 = vpow2.f32 %v1256_v41 }
0x16e1   :  { %v1433_v37 = vpop.eup %1432 }
0x16e2   :  { %1116 = vrot.lane.b32.xlu0 %v1433_v37, %s1489_s7 }
0x16e3   :  { %v1435_v42 = vpop.eup %1434 }
0x16e4   :  { %v1110_v44 = vadd.f32 1.0, %v1435_v42 }
0x16e6   :  { %386 = vperm.xlu0 %1295, %v384_v39   ;;  %1436 = vrcp.f32 %v1110_v44 }
0x16ea   :  { %722 = vperm.xlu0 %1295, %v720_v62  }
0x16ee   :  { %946 = vperm.xlu0 %1295, %v944_v63  }
0x16f2   :  { %1139 = vperm.xlu0 %1295, %v1137_v40  }
0x16f3   :  { %v1437_v43 = vpop.eup %1436 }
0x16f4   :  { %v1114_v51 = vmul.f32 %v1437_v43, %v1043_v14 }
0x1754   :  { %v1117_v2 = vpop.permute.xlu0 %1116 }
0x1755   :  { %v1119_v47 = vmul.f32 %v1437_v43, %v1117_v2 }
0x1757   :  { %1121 = vrot.lane.b32.xlu1 %v1119_v47, %s1490_s8 }
0x175b   :  { %498 = vperm.xlu1 %1296, %v496_v59  }
0x175f   :  { %610 = vperm.xlu1 %1296, %v608_v48  }
0x1761   :  { %v387_v7 = vpop.permute.xlu0 %386 }
0x1762   :  { %vm388_vm12 = vcmp.eq.s32.totalorder %v387_v7, 1 }
0x1763   :  { %834 = vperm.xlu1 %1296, %v832_v49   ;;  %v389_v24 = vsel %vm388_vm12, %v1667_v46, 0.0 }
0x1765   :  { %v723_v25 = vpop.permute.xlu0 %722 }
0x1766   :  { %vm724_vm0 = vcmp.eq.s32.totalorder %v723_v25, 1 }
0x1767   :  { %1058 = vperm.xlu1 %1296, %v1056_v50  }
0x1769   :  { %v947_v9 = vpop.permute.xlu0 %946 }
0x176a   :  { %vm948_vm4 = vcmp.eq.s32.totalorder %v947_v9, 1 }
0x176d   :  { %v1140_v3 = vpop.permute.xlu0 %1139 }
0x176e   :  { %vm1141_vm6 = vcmp.eq.s32.totalorder %v1140_v3, 1 }
0x17c9   :  { %v1122_v52 = vpop.permute.xlu1 %1121 }
0x17ca   :  { %v1124_v53 = vadd.f32 %v1122_v52, %v1114_v51 }
0x17cc   :  { %1438 = vtanh.f32 %v1124_v53 }
0x17d6   :  { %v499_v57 = vpop.permute.xlu1 %498 }
0x17d7   :  { %vm500_vm13 = vcmp.eq.s32.totalorder %v499_v57, 1 }
0x17d8   :  { %v501_v60 = vsel %vm500_vm13, %v1696_v38, %v389_v24 }
0x17d9   :  { %v1439_v56 = vpop.eup %1438 }
0x17da   :  { %1127 = vrot.lane.b32.xlu1 %v1439_v56, %s1489_s7  ;;  %v611_v61 = vpop.permute.xlu1 %610 }
0x17db   :  { %vm612_vm14 = vcmp.eq.s32.totalorder %v611_v61, 1 }
0x17dc   :  { %v613_v8 = vsel %vm612_vm14, %v1723_v30, %v501_v60 }
0x17dd   :  { %v725_v23 = vsel %vm724_vm0, %v1750_v18, %v613_v8 }
0x17de   :  { %v835_v0 = vpop.permute.xlu1 %834 }
0x17df   :  { %vm836_vm1 = vcmp.eq.s32.totalorder %v835_v0, 1 }
0x17e0   :  { %v837_v11 = vsel %vm836_vm1, %v1777_v4, %v725_v23  ;;  %v50_v4 = vld [vmem:[%s1866_s3 + $0x2] ss:$0 sm:$0xff] }
0x17e1   :  { %v949_v1 = vsel %vm948_vm4, %v1803_v45, %v837_v11 }
0x17e2   :  { %v1059_v10 = vpop.permute.xlu1 %1058 }
0x17e3   :  { %vm1060_vm5 = vcmp.eq.s32.totalorder %v1059_v10, 1 }
0x17e4   :  { %v1061_v46 = vsel %vm1060_vm5, %v1821_v22, %v949_v1 }
0x184c   :  { %v1128_v12 = vpop.permute.xlu1 %1127 }
0x184d   :  { %v1130_v17 = vmul.f32 %v1437_v43, %v1128_v12 }
0x184f   :  { %1132 = vrot.lane.b32.xlu1 %v1130_v17, %s1489_s7  ;;  %v1142_v38 = vsel %vm1141_vm6, %v1130_v17, %v1061_v46 }
0x1850   :  { %v1143_v30 = vpack.c.bf16 %v1142_v38, %v1142_v38 }
0x1852   :  { %1145 = vrot.lane.b32.xlu0 %v1143_v30, %s1490_s8 }
0x18c1   :  { %v1133_v5 = vpop.permute.xlu1 %1132 }
0x18c2   :  { %1135 = vst.msk [vmem:[#allocation2] sm:$0xff] %vm381_vm3, %v1133_v5 }
0x18c4   :  { %v1146_v18 = vpop.permute.xlu0 %1145 }
0x18c5   :  { %1283 = vmatmul.mubr.msk.bf16.vlgmr.msra.gmra.mxu0 %vm275_vm2, %v1146_v18 }
0x1985   :  { %v1196_v45 = vpop.f32.mrf.mxu0 }
0x1986   :  { %v1197_v19 = vadd.f32 %v1196_v45, %v50_v4 }
0x1987   :  { %v1284_v6 = vpop.f32.mrf.mxu0 }
0x1988   :  { %1202 = vst [vmem:[#allocation6] sm:$0xff] %v1197_v19 }
0x1989   :  { %v1199_v13 = vpop.f32.mrf.mxu0 }
0x198a   :  { %1471 = shalt.err (!%p1468_p9)
}
0x198b   :  { %1212 = dma.vmem_to_hbm [thread:$0]  %s1210_s20, 128, %s1867_s4, [#allocation5]   ;;  %v1285_v14 = vpop.f32.mrf.mxu0 }
0x198c   :  { %1482 = dma.done.wait [#allocation5], 128  }
0x198d   :  { %1483 = vsyncadd [#allocation5], 4294967168 }
0x198e   :  { %1216 = vsyncpa [#allocation4], 1 }
0x198f   :  { %1217 = vsyncpa [#allocation5], 1 }

</bundles_post_ra>
